<compile_context>
chip_gen: v7x
topology: tpu7x:2x2x1
jax: 0.10.0
libtpu: 0.0.40
codegen_flags: <defaults>
</compile_context>

<pallas_src>
import functools

import jax
import jax.numpy as jnp
from jax.experimental import pallas as pl
from jax.experimental.pallas import tpu as pltpu

EPS = 1e-5


# ----------------------------------------------------------------------------
# Helpers
# ----------------------------------------------------------------------------
def _vmem_limit_bytes():
    """Per-generation VMEM limit: ~75% of physical, capped (v7x=64MiB phys)."""
    cap = 64 * 1024 * 1024
    try:
        info = pltpu.get_tpu_info()
        cap = int(getattr(info, "vmem_capacity_bytes", cap))
    except Exception:
        pass
    return int(min(cap * 3 // 4, 96 * 1024 * 1024))


def _pick_strip_rows(total_rows, lane_width, itemsize, budget=4 << 20):
    """Largest row count that divides total_rows, is a multiple of 8, and keeps
    one strip within a VMEM byte budget (block==full array is exempt)."""
    max_rows = max(8, budget // max(1, lane_width * itemsize))
    if total_rows <= max_rows:
        return total_rows
    r = (min(max_rows, total_rows) // 8) * 8
    while r >= 8:
        if total_rows % r == 0:
            return r
        r -= 8
    return total_rows


# ----------------------------------------------------------------------------
# Kernel 1: per-lane BatchNorm statistics (strip grid, Chan-combined)
# ----------------------------------------------------------------------------
def _strip_stats_kernel(x_ref, mean_ref, m2_ref, mean_s, m2_s, *, strip_rows):
    i = pl.program_id(0)
    last = pl.num_programs(0) - 1

    blk = x_ref[...].astype(jnp.float32)                      # (TR, L)
    mu = jnp.mean(blk, axis=0, keepdims=True)                 # (1, L)
    d = blk - mu
    m2 = jnp.sum(d * d, axis=0, keepdims=True)                # centered SSQ

    @pl.when(i == 0)
    def _():
        mean_s[...] = mu
        m2_s[...] = m2

    @pl.when(i > 0)
    def _():
        # Chan parallel combine of (running: i*TR rows) with (new strip: TR rows).
        nb = jnp.full((1, 1), strip_rows, jnp.float32)
        na = jnp.full((1, 1), i * strip_rows, jnp.float32)
        frac = nb / (na + nb)
        delta = mu - mean_s[...]
        mean_s[...] = mean_s[...] + delta * frac
        m2_s[...] = m2_s[...] + m2 + delta * delta * (na * frac)

    @pl.when(i == last)
    def _():
        mean_ref[...] = mean_s[...]
        m2_ref[...] = m2_s[...]


def _per_lane_stats(v2d):
    rows, lanes = v2d.shape
    tr = _pick_strip_rows(rows, lanes, jnp.dtype(v2d.dtype).itemsize)
    return pl.pallas_call(
        functools.partial(_strip_stats_kernel, strip_rows=tr),
        out_shape=(jax.ShapeDtypeStruct((1, lanes), jnp.float32),
                   jax.ShapeDtypeStruct((1, lanes), jnp.float32)),
        grid=(rows // tr,),
        in_specs=[pl.BlockSpec((tr, lanes), lambda i: (i, 0))],
        out_specs=(pl.BlockSpec((1, lanes), lambda i: (0, 0)),
                   pl.BlockSpec((1, lanes), lambda i: (0, 0))),
        scratch_shapes=[pltpu.VMEM((1, lanes), jnp.float32),
                        pltpu.VMEM((1, lanes), jnp.float32)],
        compiler_params=pltpu.CompilerParams(
            dimension_semantics=("arbitrary",),        # accumulator axis
            vmem_limit_bytes=_vmem_limit_bytes()),
    )(v2d)


def _bn_scale_shift(mean_l, m2_l, rows, groups, c, gamma, beta):
    """Fold per-lane (w, c) stats into per-channel BN scale/shift (host-side)."""
    mean_g = mean_l.reshape(groups, c)
    m2_g = m2_l.reshape(groups, c)
    mean_c = jnp.mean(mean_g, axis=0)
    m2_c = jnp.sum(m2_g, axis=0) + rows * jnp.sum((mean_g - mean_c) ** 2, axis=0)
    var_c = m2_c / (rows * groups)                     # biased, as BN training
    scale = gamma * jax.lax.rsqrt(var_c + EPS)         # (1, c)
    shift = beta - mean_c * scale                      # (1, c)
    return scale.astype(jnp.float32), shift.astype(jnp.float32)


# ----------------------------------------------------------------------------
# Kernels 2 & 3: BN + SiLU + 3x3 conv (+ SE), batch-parallel grid
# ----------------------------------------------------------------------------
def _zero_pad_border(pad_ref):
    tb, hp, wp, c = pad_ref.shape
    dt = pad_ref.dtype
    pad_ref[:, 0:1, :, :] = jnp.zeros((tb, 1, wp, c), dt)
    pad_ref[:, hp - 1:hp, :, :] = jnp.zeros((tb, 1, wp, c), dt)
    pad_ref[:, :, 0:1, :] = jnp.zeros((tb, hp, 1, c), dt)
    pad_ref[:, :, wp - 1:wp, :] = jnp.zeros((tb, hp, 1, c), dt)


def _conv3x3_taps(pad_ref, w_ref, *, tb, ho, wo, cin, stride):
    """3x3/pad-1 conv as 9 accumulated K=cin MXU matmuls (no im2col buffer)."""
    acc = None
    for t in range(9):
        dy, dx = divmod(t, 3)
        if stride == 1:
            v = pad_ref[:, dy:dy + ho, dx:dx + wo, :]
        else:
            # TODO(synk): stride>1 tap decimation via strided pl.ds reads is wired
            # up but the demo only exercises stride=1; validate before relying on it.
            v = pad_ref[:, pl.ds(dy, ho, stride=stride),
                        pl.ds(dx, wo, stride=stride), :]
        lhs = v.reshape(tb * ho * wo, cin)                      # major-dim reshape
        d = jnp.dot(lhs, w_ref[t * cin:(t + 1) * cin, :],
                    preferred_element_type=jnp.float32)
        acc = d if acc is None else acc + d
    return acc                                                  # (tb*ho*wo, cout) f32


def _bn_swish_conv_kernel(x_ref, sc_ref, sh_ref, w_ref, h1_ref, pad_ref, *,
                          tb, h, w, cin, h1, w1, stride):
    a = x_ref[...].astype(jnp.float32) * sc_ref[...] + sh_ref[...]   # BN affine
    a = a * jax.nn.sigmoid(a)                                        # SiLU
    _zero_pad_border(pad_ref)
    pad_ref[:, 1:h + 1, 1:w + 1, :] = (
        a.reshape(tb, h, w, cin).astype(pad_ref.dtype))              # one store
    acc = _conv3x3_taps(pad_ref, w_ref, tb=tb, ho=h1, wo=w1, cin=cin, stride=stride)
    # conv1 bias intentionally omitted: a per-channel constant added before the
    # training-mode BN2 cancels exactly (mean absorbs it, variance is invariant).
    h1_ref[...] = acc.astype(h1_ref.dtype)


def _bn_swish_conv_se_kernel(h_ref, sc_ref, sh_ref, w_ref, b_ref, sew1_ref,
                             sew2_ref, y_ref, pad_ref, *, tb, h1, w1, cout):
    a = h_ref[...].astype(jnp.float32) * sc_ref[...] + sh_ref[...]
    a = a * jax.nn.sigmoid(a)
    _zero_pad_border(pad_ref)
    pad_ref[:, 1:h1 + 1, 1:w1 + 1, :] = (
        a.reshape(tb, h1, w1, cout).astype(pad_ref.dtype))
    h2 = _conv3x3_taps(pad_ref, w_ref, tb=tb, ho=h1, wo=w1, cin=cout, stride=1)
    h2 = h2 + b_ref[...]                                             # (M, cout)

    # SE gate is per-image, so it fuses into the batch-tiled grid step.
    h3 = h2.reshape(tb, h1 * w1, cout)
    pooled = jnp.mean(h3, axis=1)                                    # (tb, cout)
    z = jnp.maximum(jnp.dot(pooled.astype(sew1_ref.dtype), sew1_ref[...],
                            preferred_element_type=jnp.float32), 0.0)
    gate = jax.nn.sigmoid(jnp.dot(z.astype(sew2_ref.dtype), sew2_ref[...],
                                  preferred_element_type=jnp.float32))
    y = h3 * gate[:, None, :]
    y_ref[...] = y.reshape(tb * h1 * w1, cout).astype(y_ref.dtype)   # one store


# ----------------------------------------------------------------------------
# Wrapper
# ----------------------------------------------------------------------------
def encoder_conv_se_block(x_nhwc, params, stride=1, compute_dtype=jnp.float32):
    """Fused EncoderConvSEBlock forward. x_nhwc: (N, H, W, Cin) float32.
    compute_dtype=jnp.bfloat16 enables bf16 MXU operands / scratch on v6e/v7x."""
    N, H, W, Cin = x_nhwc.shape
    Cout = params["w1"].shape[-1]
    if stride == 1:
        H1, W1 = H, W
    elif stride == 2:
        assert H % 2 == 0 and W % 2 == 0, "stride=2 path assumes even H, W"
        H1, W1 = H // 2, W // 2
    else:
        raise NotImplementedError("stride must be 1 or 2")

    x = x_nhwc.astype(jnp.float32)
    # one image per grid step (parallel axis) unless the block row rule breaks.
    tb = 1 if (H * W) % 8 == 0 and (H1 * W1) % 8 == 0 else N
    grid = (N // tb,)
    vlim = _vmem_limit_bytes()

    # ---- BN1 stats (strip grid over the lane-folded (N*H, W*Cin) view) -------
    mean1, m21 = _per_lane_stats(x.reshape(N * H, W * Cin))
    scale1, shift1 = _bn_scale_shift(mean1, m21, N * H, W, Cin,
                                     params["g1"], params["be1"])

    w1c = params["w1"].astype(compute_dtype)
    h1 = pl.pallas_call(
        functools.partial(_bn_swish_conv_kernel, tb=tb, h=H, w=W, cin=Cin,
                          h1=H1, w1=W1, stride=stride),
        out_shape=jax.ShapeDtypeStruct((N * H1 * W1, Cout), compute_dtype),
        grid=grid,
        in_specs=[
            pl.BlockSpec((tb * H * W, Cin), lambda b: (b, 0)),
            pl.BlockSpec((1, Cin), lambda b: (0, 0)),
            pl.BlockSpec((1, Cin), lambda b: (0, 0)),
            pl.BlockSpec((9 * Cin, Cout), lambda b: (0, 0)),
        ],
        out_specs=pl.BlockSpec((tb * H1 * W1, Cout), lambda b: (b, 0)),
        scratch_shapes=[pltpu.VMEM((tb, H + 2, W + 2, Cin), compute_dtype)],
        compiler_params=pltpu.CompilerParams(
            dimension_semantics=("parallel",),     # shards across v7x's 2 TCs
            vmem_limit_bytes=vlim),
    )(x.reshape(N * H * W, Cin), scale1, shift1, w1c)

    # ---- BN2 stats over h1 (lane-folded (N*H1, W1*Cout) view) ----------------
    mean2, m22 = _per_lane_stats(h1.reshape(N * H1, W1 * Cout))
    scale2, shift2 = _bn_scale_shift(mean2, m22, N * H1, W1, Cout,
                                     params["g2"], params["be2"])

    w2c = params["w2"].astype(compute_dtype)
    sew1c = params["sew1"].astype(compute_dtype)
    sew2c = params["sew2"].astype(compute_dtype)
    y = pl.pallas_call(
        functools.partial(_bn_swish_conv_se_kernel, tb=tb, h1=H1, w1=W1, cout=Cout),
        out_shape=jax.ShapeDtypeStruct((N * H1 * W1, Cout), jnp.float32),
        grid=grid,
        in_specs=[
            pl.BlockSpec((tb * H1 * W1, Cout), lambda b: (b, 0)),
            pl.BlockSpec((1, Cout), lambda b: (0, 0)),
            pl.BlockSpec((1, Cout), lambda b: (0, 0)),
            pl.BlockSpec((9 * Cout, Cout), lambda b: (0, 0)),
            pl.BlockSpec((1, Cout), lambda b: (0, 0)),
            pl.BlockSpec(params["sew1"].shape, lambda b: (0, 0)),
            pl.BlockSpec(params["sew2"].shape, lambda b: (0, 0)),
        ],
        out_specs=pl.BlockSpec((tb * H1 * W1, Cout), lambda b: (b, 0)),
        scratch_shapes=[pltpu.VMEM((tb, H1 + 2, W1 + 2, Cout), compute_dtype)],
        compiler_params=pltpu.CompilerParams(
            dimension_semantics=("parallel",),
            vmem_limit_bytes=vlim),
    )(h1, scale2, shift2, w2c, params["b2"], sew1c, sew2c)

    return y.reshape(N, H1, W1, Cout)


# ----------------------------------------------------------------------------
# Deterministic synthetic parameters (mirrors module __init__ shapes)
# ----------------------------------------------------------------------------
def _spectral_normalize(w_hwio):
    # torch spectral_norm: W / sigma_max(W.reshape(out, -1)); exact top singular
    # value used instead of the power-iteration estimate (pure weight reparam).
    kh, kw, ci, co = w_hwio.shape
    mat = jnp.transpose(w_hwio, (3, 2, 0, 1)).reshape(co, -1)
    sigma = jnp.linalg.norm(mat, ord=2)
    return w_hwio / sigma


def init_params(key, in_channels, out_channels, reduction=8):
    Ci, Co = in_channels, out_channels
    Cr = Co // reduction
    ks = jax.random.split(key, 10)
    w1_hwio = _spectral_normalize(
        0.3 * jax.random.normal(ks[0], (3, 3, Ci, Co), jnp.float32))
    w2_hwio = _spectral_normalize(
        0.3 * jax.random.normal(ks[4], (3, 3, Co, Co), jnp.float32))
    return {
        "w1_hwio": w1_hwio,
        "w1": w1_hwio.reshape(9 * Ci, Co),     # per-tap folded for the kernel
        "b1": 0.1 * jax.random.normal(ks[1], (1, Co), jnp.float32),  # reference only
        "g1": 1.0 + 0.1 * jax.random.normal(ks[2], (1, Ci), jnp.float32),
        "be1": 0.1 * jax.random.normal(ks[3], (1, Ci), jnp.float32),
        "w2_hwio": w2_hwio,
        "w2": w2_hwio.reshape(9 * Co, Co),
        "b2": 0.1 * jax.random.normal(ks[5], (1, Co), jnp.float32),
        "g2": 1.0 + 0.1 * jax.random.normal(ks[6], (1, Co), jnp.float32),
        "be2": 0.1 * jax.random.normal(ks[7], (1, Co), jnp.float32),
        "sew1": 0.5 * jax.random.normal(ks[8], (Co, Cr), jnp.float32),
        "sew2": 0.5 * jax.random.normal(ks[9], (Cr, Co), jnp.float32),
    }


# ----------------------------------------------------------------------------
# Pure-JAX reference (correctness check)
# ----------------------------------------------------------------------------
def reference_forward(x_nhwc, p, stride=1):
    def bn_swish(v, g, b):
        mean = v.mean(axis=(0, 1, 2), keepdims=True)
        var = ((v - mean) ** 2).mean(axis=(0, 1, 2), keepdims=True)
        h = (v - mean) / jnp.sqrt(var + EPS) * g + b
        return h * jax.nn.sigmoid(h)

    def conv(v, w_hwio, b, s):
        o = jax.lax.conv_general_dilated(
            v, w_hwio, (s, s), [(1, 1), (1, 1)],
            dimension_numbers=("NHWC", "HWIO", "NHWC"))
        return o + b

    h = conv(bn_swish(x_nhwc, p["g1"], p["be1"]), p["w1_hwio"], p["b1"], stride)
    h = conv(bn_swish(h, p["g2"], p["be2"]), p["w2_hwio"], p["b2"], 1)
    s = h.mean(axis=(1, 2))
    z = jnp.maximum(s @ p["sew1"], 0.0)
    gate = jax.nn.sigmoid(z @ p["sew2"])
    return h * gate[:, None, None, :]


if __name__ == "__main__":
    N, H, W = 2, 8, 8
    Cin, Cout, stride = 16, 32, 1         # SE reduction=8 -> out_channels >= 8
    key = jax.random.PRNGKey(0)
    kx, kp = jax.random.split(key)

    x = jax.random.normal(kx, (N, H, W, Cin), jnp.float32)   # NHWC activations
    params = init_params(kp, Cin, Cout)

    fwd = jax.jit(functools.partial(encoder_conv_se_block, stride=stride))
    y = jax.block_until_ready(fwd(x, params))

    y_ref = reference_forward(x, params, stride)
    assert y.shape == y_ref.shape == (N, H, W, Cout)
    assert bool(jnp.all(jnp.isfinite(y)))
    max_err = float(jnp.max(jnp.abs(y - y_ref)))
    assert jnp.allclose(y, y_ref, rtol=1e-2, atol=1e-2), max_err

    print("KERNEL_OK")
</pallas_src>

<mosaic_0001>
module attributes {stable_mosaic.version = 11 : i64} {
  func.func @_strip_stats_kernel(%arg0: i32, %arg1: memref<16x128xf32, #tpu.memory_space<vmem>>, %arg2: memref<1x128xf32, #tpu.memory_space<vmem>>, %arg3: memref<1x128xf32, #tpu.memory_space<vmem>>, %arg4: memref<1x128xf32, #tpu.memory_space<vmem>>, %arg5: memref<1x128xf32, #tpu.memory_space<vmem>>) attributes {dimension_semantics = [#tpu.dimension_semantics<arbitrary>], iteration_bounds = array<i64: 1>, scalar_prefetch = 0 : i64, scratch_operands = 2 : i64, tpu.core_type = #tpu.core_type<tc>, window_params = [{transform_indices = @transform_0, window_bounds = array<i64: 16, 128>}, {pipeline_mode = #tpu.pipeline_mode<synchronous>, transform_indices = @transform_1, window_bounds = array<i64: 1, 128>}, {pipeline_mode = #tpu.pipeline_mode<synchronous>, transform_indices = @transform_2, window_bounds = array<i64: 1, 128>}]} {
    %c0 = arith.constant 0 : index
    %c0_0 = arith.constant 0 : index
    %0 = vector.load %arg1[%c0, %c0_0] : memref<16x128xf32, #tpu.memory_space<vmem>>, vector<16x128xf32>
    %cst = arith.constant dense<0.000000e+00> : vector<128xf32>
    %1 = vector.multi_reduction <add>, %0, %cst [0] : vector<16x128xf32> to vector<128xf32>
    %2 = vector.shape_cast %1 : vector<128xf32> to vector<1x128xf32>
    %cst_1 = arith.constant 1.600000e+01 : f32
    %3 = vector.broadcast %cst_1 : f32 to vector<1x128xf32>
    %4 = arith.divf %2, %3 : vector<1x128xf32>
    %5 = vector.broadcast %4 : vector<1x128xf32> to vector<16x128xf32>
    %6 = arith.subf %0, %5 : vector<16x128xf32>
    %7 = arith.mulf %6, %6 : vector<16x128xf32>
    %cst_2 = arith.constant dense<0.000000e+00> : vector<128xf32>
    %8 = vector.multi_reduction <add>, %7, %cst_2 [0] : vector<16x128xf32> to vector<128xf32>
    %9 = vector.shape_cast %8 : vector<128xf32> to vector<1x128xf32>
    %c0_i32 = arith.constant 0 : i32
    %10 = arith.cmpi eq, %arg0, %c0_i32 : i32
    %11 = arith.extui %10 : i1 to i32
    %c0_i32_3 = arith.constant 0 : i32
    %12 = arith.cmpi ne, %11, %c0_i32_3 : i32
    scf.if %12 {
      %c0_8 = arith.constant 0 : index
      %c0_9 = arith.constant 0 : index
      %19 = vector.load %arg4[%c0_8, %c0_9] : memref<1x128xf32, #tpu.memory_space<vmem>>, vector<1x128xf32>
      tpu.vector_store %arg4[%c0_8, %c0_9], %4 {strides = array<i32>} : memref<1x128xf32, #tpu.memory_space<vmem>>, vector<1x128xf32>,
      %c0_10 = arith.constant 0 : index
      %c0_11 = arith.constant 0 : index
      %20 = vector.load %arg5[%c0_10, %c0_11] : memref<1x128xf32, #tpu.memory_space<vmem>>, vector<1x128xf32>
      tpu.vector_store %arg5[%c0_10, %c0_11], %9 {strides = array<i32>} : memref<1x128xf32, #tpu.memory_space<vmem>>, vector<1x128xf32>,
    } else {
    }
    %c0_i32_4 = arith.constant 0 : i32
    %13 = arith.cmpi sgt, %arg0, %c0_i32_4 : i32
    %14 = arith.extui %13 : i1 to i32
    %c0_i32_5 = arith.constant 0 : i32
    %15 = arith.cmpi ne, %14, %c0_i32_5 : i32
    scf.if %15 {
      %cst_8 = arith.constant 1.600000e+01 : f32
      %19 = vector.broadcast %cst_8 : f32 to vector<1x1xf32>
      %c16_i32 = arith.constant 16 : i32
      %20 = arith.muli %arg0, %c16_i32 : i32
      %21 = arith.sitofp %20 : i32 to f32
      %22 = vector.broadcast %21 : f32 to vector<1x1xf32>
      %23 = arith.addf %22, %19 : vector<1x1xf32>
      %24 = arith.divf %19, %23 : vector<1x1xf32>
      %c0_9 = arith.constant 0 : index
      %c0_10 = arith.constant 0 : index
      %25 = vector.load %arg4[%c0_9, %c0_10] : memref<1x128xf32, #tpu.memory_space<vmem>>, vector<1x128xf32>
      %26 = arith.subf %4, %25 : vector<1x128xf32>
      %c0_11 = arith.constant 0 : index
      %c0_12 = arith.constant 0 : index
      %27 = vector.load %arg4[%c0_11, %c0_12] : memref<1x128xf32, #tpu.memory_space<vmem>>, vector<1x128xf32>
      %28 = vector.broadcast %24 : vector<1x1xf32> to vector<1x128xf32>
      %29 = arith.mulf %26, %28 : vector<1x128xf32>
      %30 = arith.addf %27, %29 : vector<1x128xf32>
      %c0_13 = arith.constant 0 : index
      %c0_14 = arith.constant 0 : index
      %31 = vector.load %arg4[%c0_13, %c0_14] : memref<1x128xf32, #tpu.memory_space<vmem>>, vector<1x128xf32>
      tpu.vector_store %arg4[%c0_13, %c0_14], %30 {strides = array<i32>} : memref<1x128xf32, #tpu.memory_space<vmem>>, vector<1x128xf32>,
      %c0_15 = arith.constant 0 : index
      %c0_16 = arith.constant 0 : index
      %32 = vector.load %arg5[%c0_15, %c0_16] : memref<1x128xf32, #tpu.memory_space<vmem>>, vector<1x128xf32>
      %33 = arith.addf %32, %9 : vector<1x128xf32>
      %34 = arith.mulf %26, %26 : vector<1x128xf32>
      %35 = arith.mulf %22, %24 : vector<1x1xf32>
      %36 = vector.broadcast %35 : vector<1x1xf32> to vector<1x128xf32>
      %37 = arith.mulf %34, %36 : vector<1x128xf32>
      %38 = arith.addf %33, %37 : vector<1x128xf32>
      %c0_17 = arith.constant 0 : index
      %c0_18 = arith.constant 0 : index
      %39 = vector.load %arg5[%c0_17, %c0_18] : memref<1x128xf32, #tpu.memory_space<vmem>>, vector<1x128xf32>
      tpu.vector_store %arg5[%c0_17, %c0_18], %38 {strides = array<i32>} : memref<1x128xf32, #tpu.memory_space<vmem>>, vector<1x128xf32>,
    } else {
    }
    %c0_i32_6 = arith.constant 0 : i32
    %16 = arith.cmpi eq, %arg0, %c0_i32_6 : i32
    %17 = arith.extui %16 : i1 to i32
    %c0_i32_7 = arith.constant 0 : i32
    %18 = arith.cmpi ne, %17, %c0_i32_7 : i32
    scf.if %18 {
      %c0_8 = arith.constant 0 : index
      %c0_9 = arith.constant 0 : index
      %19 = vector.load %arg4[%c0_8, %c0_9] : memref<1x128xf32, #tpu.memory_space<vmem>>, vector<1x128xf32>
      %c0_10 = arith.constant 0 : index
      %c0_11 = arith.constant 0 : index
      %20 = vector.load %arg2[%c0_10, %c0_11] : memref<1x128xf32, #tpu.memory_space<vmem>>, vector<1x128xf32>
      tpu.vector_store %arg2[%c0_10, %c0_11], %19 {strides = array<i32>} : memref<1x128xf32, #tpu.memory_space<vmem>>, vector<1x128xf32>,
      %c0_12 = arith.constant 0 : index
      %c0_13 = arith.constant 0 : index
      %21 = vector.load %arg5[%c0_12, %c0_13] : memref<1x128xf32, #tpu.memory_space<vmem>>, vector<1x128xf32>
      %c0_14 = arith.constant 0 : index
      %c0_15 = arith.constant 0 : index
      %22 = vector.load %arg3[%c0_14, %c0_15] : memref<1x128xf32, #tpu.memory_space<vmem>>, vector<1x128xf32>
      tpu.vector_store %arg3[%c0_14, %c0_15], %21 {strides = array<i32>} : memref<1x128xf32, #tpu.memory_space<vmem>>, vector<1x128xf32>,
    } else {
    }
    return
  }
  func.func @transform_0(%arg0: i32) -> (i32, i32) {
    %c0_i32 = arith.constant 0 : i32
    %c0_i32_0 = arith.constant 0 : i32
    return %arg0, %c0_i32 : i32, i32
  }
  func.func @transform_1(%arg0: i32) -> (i32, i32) {
    %c0_i32 = arith.constant 0 : i32
    %c0_i32_0 = arith.constant 0 : i32
    %c0_i32_1 = arith.constant 0 : i32
    return %c0_i32, %c0_i32_0 : i32, i32
  }
  func.func @transform_2(%arg0: i32) -> (i32, i32) {
    %c0_i32 = arith.constant 0 : i32
    %c0_i32_0 = arith.constant 0 : i32
    %c0_i32_1 = arith.constant 0 : i32
    return %c0_i32, %c0_i32_0 : i32, i32
  }
}

module attributes {stable_mosaic.version = 11 : i64} {
  func.func @_bn_swish_conv_kernel(%arg0: i32, %arg1: memref<64x16xf32, #tpu.memory_space<vmem>>, %arg2: memref<1x16xf32, #tpu.memory_space<vmem>>, %arg3: memref<1x16xf32, #tpu.memory_space<vmem>>, %arg4: memref<144x32xf32, #tpu.memory_space<vmem>>, %arg5: memref<64x32xf32, #tpu.memory_space<vmem>>, %arg6: memref<1x10x10x16xf32, #tpu.memory_space<vmem>>) attributes {dimension_semantics = [#tpu.dimension_semantics<parallel>], iteration_bounds = array<i64: 2>, scalar_prefetch = 0 : i64, scratch_operands = 1 : i64, tpu.core_type = #tpu.core_type<tc>, window_params = [{transform_indices = @transform_0, window_bounds = array<i64: 64, 16>}, {pipeline_mode = #tpu.pipeline_mode<synchronous>, transform_indices = @transform_1, window_bounds = array<i64: 1, 16>}, {pipeline_mode = #tpu.pipeline_mode<synchronous>, transform_indices = @transform_2, window_bounds = array<i64: 1, 16>}, {pipeline_mode = #tpu.pipeline_mode<synchronous>, transform_indices = @transform_3, window_bounds = array<i64: 144, 32>}, {transform_indices = @transform_4, window_bounds = array<i64: 64, 32>}]} {
    %c0 = arith.constant 0 : index
    %c0_0 = arith.constant 0 : index
    %0 = vector.load %arg1[%c0, %c0_0] : memref<64x16xf32, #tpu.memory_space<vmem>>, vector<64x16xf32>
    %c0_1 = arith.constant 0 : index
    %c0_2 = arith.constant 0 : index
    %1 = vector.load %arg2[%c0_1, %c0_2] : memref<1x16xf32, #tpu.memory_space<vmem>>, vector<1x16xf32>
    %2 = vector.broadcast %1 : vector<1x16xf32> to vector<64x16xf32>
    %3 = arith.mulf %0, %2 : vector<64x16xf32>
    %c0_3 = arith.constant 0 : index
    %c0_4 = arith.constant 0 : index
    %4 = vector.load %arg3[%c0_3, %c0_4] : memref<1x16xf32, #tpu.memory_space<vmem>>, vector<1x16xf32>
    %5 = vector.broadcast %4 : vector<1x16xf32> to vector<64x16xf32>
    %6 = arith.addf %3, %5 : vector<64x16xf32>
    %7 = arith.negf %6 : vector<64x16xf32>
    %8 = math.exp %7 : vector<64x16xf32>
    %cst = arith.constant 1.000000e+00 : f32
    %9 = vector.broadcast %cst : f32 to vector<64x16xf32>
    %10 = arith.addf %9, %8 : vector<64x16xf32>
    %11 = arith.divf %9, %10 : vector<64x16xf32>
    %12 = arith.mulf %6, %11 : vector<64x16xf32>
    %cst_5 = arith.constant 0.000000e+00 : f32
    %13 = vector.broadcast %cst_5 : f32 to vector<1x1x10x16xf32>
    %c0_6 = arith.constant 0 : index
    %c0_7 = arith.constant 0 : index
    %c0_8 = arith.constant 0 : index
    %c0_9 = arith.constant 0 : index
    %14 = vector.load %arg6[%c0_6, %c0_7, %c0_8, %c0_9] : memref<1x10x10x16xf32, #tpu.memory_space<vmem>>, vector<1x1x10x16xf32>
    tpu.vector_store %arg6[%c0_6, %c0_7, %c0_8, %c0_9], %13 {strides = array<i32>} : memref<1x10x10x16xf32, #tpu.memory_space<vmem>>, vector<1x1x10x16xf32>,
    %cst_10 = arith.constant 0.000000e+00 : f32
    %15 = vector.broadcast %cst_10 : f32 to vector<1x1x10x16xf32>
    %c0_11 = arith.constant 0 : index
    %c9 = arith.constant 9 : index
    %c0_12 = arith.constant 0 : index
    %c0_13 = arith.constant 0 : index
    %16 = vector.load %arg6[%c0_11, %c9, %c0_12, %c0_13] : memref<1x10x10x16xf32, #tpu.memory_space<vmem>>, vector<1x1x10x16xf32>
    tpu.vector_store %arg6[%c0_11, %c9, %c0_12, %c0_13], %15 {strides = array<i32>} : memref<1x10x10x16xf32, #tpu.memory_space<vmem>>, vector<1x1x10x16xf32>,
    %cst_14 = arith.constant 0.000000e+00 : f32
    %17 = vector.broadcast %cst_14 : f32 to vector<1x10x1x16xf32>
    %c0_15 = arith.constant 0 : index
    %c0_16 = arith.constant 0 : index
    %c0_17 = arith.constant 0 : index
    %c0_18 = arith.constant 0 : index
    %18 = vector.load %arg6[%c0_15, %c0_16, %c0_17, %c0_18] : memref<1x10x10x16xf32, #tpu.memory_space<vmem>>, vector<1x10x1x16xf32>
    tpu.vector_store %arg6[%c0_15, %c0_16, %c0_17, %c0_18], %17 {strides = array<i32>} : memref<1x10x10x16xf32, #tpu.memory_space<vmem>>, vector<1x10x1x16xf32>,
    %cst_19 = arith.constant 0.000000e+00 : f32
    %19 = vector.broadcast %cst_19 : f32 to vector<1x10x1x16xf32>
    %c0_20 = arith.constant 0 : index
    %c0_21 = arith.constant 0 : index
    %c9_22 = arith.constant 9 : index
    %c0_23 = arith.constant 0 : index
    %20 = vector.load %arg6[%c0_20, %c0_21, %c9_22, %c0_23] : memref<1x10x10x16xf32, #tpu.memory_space<vmem>>, vector<1x10x1x16xf32>
    tpu.vector_store %arg6[%c0_20, %c0_21, %c9_22, %c0_23], %19 {strides = array<i32>} : memref<1x10x10x16xf32, #tpu.memory_space<vmem>>, vector<1x10x1x16xf32>,
    %21 = vector.shape_cast %12 : vector<64x16xf32> to vector<1x8x8x16xf32>
    %c0_24 = arith.constant 0 : index
    %c1 = arith.constant 1 : index
    %c1_25 = arith.constant 1 : index
    %c0_26 = arith.constant 0 : index
    %22 = vector.load %arg6[%c0_24, %c1, %c1_25, %c0_26] : memref<1x10x10x16xf32, #tpu.memory_space<vmem>>, vector<1x8x8x16xf32>
    tpu.vector_store %arg6[%c0_24, %c1, %c1_25, %c0_26], %21 {strides = array<i32>} : memref<1x10x10x16xf32, #tpu.memory_space<vmem>>, vector<1x8x8x16xf32>,
    %c0_27 = arith.constant 0 : index
    %c0_28 = arith.constant 0 : index
    %c0_29 = arith.constant 0 : index
    %c0_30 = arith.constant 0 : index
    %23 = vector.load %arg6[%c0_27, %c0_28, %c0_29, %c0_30] : memref<1x10x10x16xf32, #tpu.memory_space<vmem>>, vector<1x8x8x16xf32>
    %24 = vector.shape_cast %23 : vector<1x8x8x16xf32> to vector<64x16xf32>
    %c0_31 = arith.constant 0 : index
    %c0_32 = arith.constant 0 : index
    %25 = vector.load %arg4[%c0_31, %c0_32] : memref<144x32xf32, #tpu.memory_space<vmem>>, vector<16x32xf32>
    %cst_33 = arith.constant dense<0.000000e+00> : vector<64x32xf32>
    %26 = tpu.matmul %24, %25, %cst_33 {dimension_numbers = #tpu.dot_dimension_numbers<[1], [0], [0], [1], [0, 0, 1, 1], [], []>} : vector<64x16xf32>, vector<16x32xf32>, vector<64x32xf32> -> vector<64x32xf32>
    %c0_34 = arith.constant 0 : index
    %c0_35 = arith.constant 0 : index
    %c1_36 = arith.constant 1 : index
    %c0_37 = arith.constant 0 : index
    %27 = vector.load %arg6[%c0_34, %c0_35, %c1_36, %c0_37] : memref<1x10x10x16xf32, #tpu.memory_space<vmem>>, vector<1x8x8x16xf32>
    %28 = vector.shape_cast %27 : vector<1x8x8x16xf32> to vector<64x16xf32>
    %c16 = arith.constant 16 : index
    %c0_38 = arith.constant 0 : index
    %29 = vector.load %arg4[%c16, %c0_38] : memref<144x32xf32, #tpu.memory_space<vmem>>, vector<16x32xf32>
    %cst_39 = arith.constant dense<0.000000e+00> : vector<64x32xf32>
    %30 = tpu.matmul %28, %29, %cst_39 {dimension_numbers = #tpu.dot_dimension_numbers<[1], [0], [0], [1], [0, 0, 1, 1], [], []>} : vector<64x16xf32>, vector<16x32xf32>, vector<64x32xf32> -> vector<64x32xf32>
    %31 = arith.addf %26, %30 : vector<64x32xf32>
    %c0_40 = arith.constant 0 : index
    %c0_41 = arith.constant 0 : index
    %c2 = arith.constant 2 : index
    %c0_42 = arith.constant 0 : index
    %32 = vector.load %arg6[%c0_40, %c0_41, %c2, %c0_42] : memref<1x10x10x16xf32, #tpu.memory_space<vmem>>, vector<1x8x8x16xf32>
    %33 = vector.shape_cast %32 : vector<1x8x8x16xf32> to vector<64x16xf32>
    %c32 = arith.constant 32 : index
    %c0_43 = arith.constant 0 : index
    %34 = vector.load %arg4[%c32, %c0_43] : memref<144x32xf32, #tpu.memory_space<vmem>>, vector<16x32xf32>
    %cst_44 = arith.constant dense<0.000000e+00> : vector<64x32xf32>
    %35 = tpu.matmul %33, %34, %cst_44 {dimension_numbers = #tpu.dot_dimension_numbers<[1], [0], [0], [1], [0, 0, 1, 1], [], []>} : vector<64x16xf32>, vector<16x32xf32>, vector<64x32xf32> -> vector<64x32xf32>
    %36 = arith.addf %31, %35 : vector<64x32xf32>
    %c0_45 = arith.constant 0 : index
    %c1_46 = arith.constant 1 : index
    %c0_47 = arith.constant 0 : index
    %c0_48 = arith.constant 0 : index
    %37 = vector.load %arg6[%c0_45, %c1_46, %c0_47, %c0_48] : memref<1x10x10x16xf32, #tpu.memory_space<vmem>>, vector<1x8x8x16xf32>
    %38 = vector.shape_cast %37 : vector<1x8x8x16xf32> to vector<64x16xf32>
    %c48 = arith.constant 48 : index
    %c0_49 = arith.constant 0 : index
    %39 = vector.load %arg4[%c48, %c0_49] : memref<144x32xf32, #tpu.memory_space<vmem>>, vector<16x32xf32>
    %cst_50 = arith.constant dense<0.000000e+00> : vector<64x32xf32>
    %40 = tpu.matmul %38, %39, %cst_50 {dimension_numbers = #tpu.dot_dimension_numbers<[1], [0], [0], [1], [0, 0, 1, 1], [], []>} : vector<64x16xf32>, vector<16x32xf32>, vector<64x32xf32> -> vector<64x32xf32>
    %41 = arith.addf %36, %40 : vector<64x32xf32>
    %c0_51 = arith.constant 0 : index
    %c1_52 = arith.constant 1 : index
    %c1_53 = arith.constant 1 : index
    %c0_54 = arith.constant 0 : index
    %42 = vector.load %arg6[%c0_51, %c1_52, %c1_53, %c0_54] : memref<1x10x10x16xf32, #tpu.memory_space<vmem>>, vector<1x8x8x16xf32>
    %43 = vector.shape_cast %42 : vector<1x8x8x16xf32> to vector<64x16xf32>
    %c64 = arith.constant 64 : index
    %c0_55 = arith.constant 0 : index
    %44 = vector.load %arg4[%c64, %c0_55] : memref<144x32xf32, #tpu.memory_space<vmem>>, vector<16x32xf32>
    %cst_56 = arith.constant dense<0.000000e+00> : vector<64x32xf32>
    %45 = tpu.matmul %43, %44, %cst_56 {dimension_numbers = #tpu.dot_dimension_numbers<[1], [0], [0], [1], [0, 0, 1, 1], [], []>} : vector<64x16xf32>, vector<16x32xf32>, vector<64x32xf32> -> vector<64x32xf32>
    %46 = arith.addf %41, %45 : vector<64x32xf32>
    %c0_57 = arith.constant 0 : index
    %c1_58 = arith.constant 1 : index
    %c2_59 = arith.constant 2 : index
    %c0_60 = arith.constant 0 : index
    %47 = vector.load %arg6[%c0_57, %c1_58, %c2_59, %c0_60] : memref<1x10x10x16xf32, #tpu.memory_space<vmem>>, vector<1x8x8x16xf32>
    %48 = vector.shape_cast %47 : vector<1x8x8x16xf32> to vector<64x16xf32>
    %c80 = arith.constant 80 : index
    %c0_61 = arith.constant 0 : index
    %49 = vector.load %arg4[%c80, %c0_61] : memref<144x32xf32, #tpu.memory_space<vmem>>, vector<16x32xf32>
    %cst_62 = arith.constant dense<0.000000e+00> : vector<64x32xf32>
    %50 = tpu.matmul %48, %49, %cst_62 {dimension_numbers = #tpu.dot_dimension_numbers<[1], [0], [0], [1], [0, 0, 1, 1], [], []>} : vector<64x16xf32>, vector<16x32xf32>, vector<64x32xf32> -> vector<64x32xf32>
    %51 = arith.addf %46, %50 : vector<64x32xf32>
    %c0_63 = arith.constant 0 : index
    %c2_64 = arith.constant 2 : index
    %c0_65 = arith.constant 0 : index
    %c0_66 = arith.constant 0 : index
    %52 = vector.load %arg6[%c0_63, %c2_64, %c0_65, %c0_66] : memref<1x10x10x16xf32, #tpu.memory_space<vmem>>, vector<1x8x8x16xf32>
    %53 = vector.shape_cast %52 : vector<1x8x8x16xf32> to vector<64x16xf32>
    %c96 = arith.constant 96 : index
    %c0_67 = arith.constant 0 : index
    %54 = vector.load %arg4[%c96, %c0_67] : memref<144x32xf32, #tpu.memory_space<vmem>>, vector<16x32xf32>
    %cst_68 = arith.constant dense<0.000000e+00> : vector<64x32xf32>
    %55 = tpu.matmul %53, %54, %cst_68 {dimension_numbers = #tpu.dot_dimension_numbers<[1], [0], [0], [1], [0, 0, 1, 1], [], []>} : vector<64x16xf32>, vector<16x32xf32>, vector<64x32xf32> -> vector<64x32xf32>
    %56 = arith.addf %51, %55 : vector<64x32xf32>
    %c0_69 = arith.constant 0 : index
    %c2_70 = arith.constant 2 : index
    %c1_71 = arith.constant 1 : index
    %c0_72 = arith.constant 0 : index
    %57 = vector.load %arg6[%c0_69, %c2_70, %c1_71, %c0_72] : memref<1x10x10x16xf32, #tpu.memory_space<vmem>>, vector<1x8x8x16xf32>
    %58 = vector.shape_cast %57 : vector<1x8x8x16xf32> to vector<64x16xf32>
    %c112 = arith.constant 112 : index
    %c0_73 = arith.constant 0 : index
    %59 = vector.load %arg4[%c112, %c0_73] : memref<144x32xf32, #tpu.memory_space<vmem>>, vector<16x32xf32>
    %cst_74 = arith.constant dense<0.000000e+00> : vector<64x32xf32>
    %60 = tpu.matmul %58, %59, %cst_74 {dimension_numbers = #tpu.dot_dimension_numbers<[1], [0], [0], [1], [0, 0, 1, 1], [], []>} : vector<64x16xf32>, vector<16x32xf32>, vector<64x32xf32> -> vector<64x32xf32>
    %61 = arith.addf %56, %60 : vector<64x32xf32>
    %c0_75 = arith.constant 0 : index
    %c2_76 = arith.constant 2 : index
    %c2_77 = arith.constant 2 : index
    %c0_78 = arith.constant 0 : index
    %62 = vector.load %arg6[%c0_75, %c2_76, %c2_77, %c0_78] : memref<1x10x10x16xf32, #tpu.memory_space<vmem>>, vector<1x8x8x16xf32>
    %63 = vector.shape_cast %62 : vector<1x8x8x16xf32> to vector<64x16xf32>
    %c128 = arith.constant 128 : index
    %c0_79 = arith.constant 0 : index
    %64 = vector.load %arg4[%c128, %c0_79] : memref<144x32xf32, #tpu.memory_space<vmem>>, vector<16x32xf32>
    %cst_80 = arith.constant dense<0.000000e+00> : vector<64x32xf32>
    %65 = tpu.matmul %63, %64, %cst_80 {dimension_numbers = #tpu.dot_dimension_numbers<[1], [0], [0], [1], [0, 0, 1, 1], [], []>} : vector<64x16xf32>, vector<16x32xf32>, vector<64x32xf32> -> vector<64x32xf32>
    %66 = arith.addf %61, %65 : vector<64x32xf32>
    %c0_81 = arith.constant 0 : index
    %c0_82 = arith.constant 0 : index
    %67 = vector.load %arg5[%c0_81, %c0_82] : memref<64x32xf32, #tpu.memory_space<vmem>>, vector<64x32xf32>
    tpu.vector_store %arg5[%c0_81, %c0_82], %66 {strides = array<i32>} : memref<64x32xf32, #tpu.memory_space<vmem>>, vector<64x32xf32>,
    return
  }
  func.func @transform_0(%arg0: i32) -> (i32, i32) {
    %c0_i32 = arith.constant 0 : i32
    %c0_i32_0 = arith.constant 0 : i32
    return %arg0, %c0_i32 : i32, i32
  }
  func.func @transform_1(%arg0: i32) -> (i32, i32) {
    %c0_i32 = arith.constant 0 : i32
    %c0_i32_0 = arith.constant 0 : i32
    %c0_i32_1 = arith.constant 0 : i32
    return %c0_i32, %c0_i32_0 : i32, i32
  }
  func.func @transform_2(%arg0: i32) -> (i32, i32) {
    %c0_i32 = arith.constant 0 : i32
    %c0_i32_0 = arith.constant 0 : i32
    %c0_i32_1 = arith.constant 0 : i32
    return %c0_i32, %c0_i32_0 : i32, i32
  }
  func.func @transform_3(%arg0: i32) -> (i32, i32) {
    %c0_i32 = arith.constant 0 : i32
    %c0_i32_0 = arith.constant 0 : i32
    %c0_i32_1 = arith.constant 0 : i32
    return %c0_i32, %c0_i32_0 : i32, i32
  }
  func.func @transform_4(%arg0: i32) -> (i32, i32) {
    %c0_i32 = arith.constant 0 : i32
    %c0_i32_0 = arith.constant 0 : i32
    return %arg0, %c0_i32 : i32, i32
  }
}

module attributes {stable_mosaic.version = 11 : i64} {
  func.func @_strip_stats_kernel(%arg0: i32, %arg1: memref<16x256xf32, #tpu.memory_space<vmem>>, %arg2: memref<1x256xf32, #tpu.memory_space<vmem>>, %arg3: memref<1x256xf32, #tpu.memory_space<vmem>>, %arg4: memref<1x256xf32, #tpu.memory_space<vmem>>, %arg5: memref<1x256xf32, #tpu.memory_space<vmem>>) attributes {dimension_semantics = [#tpu.dimension_semantics<arbitrary>], iteration_bounds = array<i64: 1>, scalar_prefetch = 0 : i64, scratch_operands = 2 : i64, tpu.core_type = #tpu.core_type<tc>, window_params = [{transform_indices = @transform_0, window_bounds = array<i64: 16, 256>}, {pipeline_mode = #tpu.pipeline_mode<synchronous>, transform_indices = @transform_1, window_bounds = array<i64: 1, 256>}, {pipeline_mode = #tpu.pipeline_mode<synchronous>, transform_indices = @transform_2, window_bounds = array<i64: 1, 256>}]} {
    %c0 = arith.constant 0 : index
    %c0_0 = arith.constant 0 : index
    %0 = vector.load %arg1[%c0, %c0_0] : memref<16x256xf32, #tpu.memory_space<vmem>>, vector<16x256xf32>
    %cst = arith.constant dense<0.000000e+00> : vector<256xf32>
    %1 = vector.multi_reduction <add>, %0, %cst [0] : vector<16x256xf32> to vector<256xf32>
    %2 = vector.shape_cast %1 : vector<256xf32> to vector<1x256xf32>
    %cst_1 = arith.constant 1.600000e+01 : f32
    %3 = vector.broadcast %cst_1 : f32 to vector<1x256xf32>
    %4 = arith.divf %2, %3 : vector<1x256xf32>
    %5 = vector.broadcast %4 : vector<1x256xf32> to vector<16x256xf32>
    %6 = arith.subf %0, %5 : vector<16x256xf32>
    %7 = arith.mulf %6, %6 : vector<16x256xf32>
    %cst_2 = arith.constant dense<0.000000e+00> : vector<256xf32>
    %8 = vector.multi_reduction <add>, %7, %cst_2 [0] : vector<16x256xf32> to vector<256xf32>
    %9 = vector.shape_cast %8 : vector<256xf32> to vector<1x256xf32>
    %c0_i32 = arith.constant 0 : i32
    %10 = arith.cmpi eq, %arg0, %c0_i32 : i32
    %11 = arith.extui %10 : i1 to i32
    %c0_i32_3 = arith.constant 0 : i32
    %12 = arith.cmpi ne, %11, %c0_i32_3 : i32
    scf.if %12 {
      %c0_8 = arith.constant 0 : index
      %c0_9 = arith.constant 0 : index
      %19 = vector.load %arg4[%c0_8, %c0_9] : memref<1x256xf32, #tpu.memory_space<vmem>>, vector<1x256xf32>
      tpu.vector_store %arg4[%c0_8, %c0_9], %4 {strides = array<i32>} : memref<1x256xf32, #tpu.memory_space<vmem>>, vector<1x256xf32>,
      %c0_10 = arith.constant 0 : index
      %c0_11 = arith.constant 0 : index
      %20 = vector.load %arg5[%c0_10, %c0_11] : memref<1x256xf32, #tpu.memory_space<vmem>>, vector<1x256xf32>
      tpu.vector_store %arg5[%c0_10, %c0_11], %9 {strides = array<i32>} : memref<1x256xf32, #tpu.memory_space<vmem>>, vector<1x256xf32>,
    } else {
    }
    %c0_i32_4 = arith.constant 0 : i32
    %13 = arith.cmpi sgt, %arg0, %c0_i32_4 : i32
    %14 = arith.extui %13 : i1 to i32
    %c0_i32_5 = arith.constant 0 : i32
    %15 = arith.cmpi ne, %14, %c0_i32_5 : i32
    scf.if %15 {
      %cst_8 = arith.constant 1.600000e+01 : f32
      %19 = vector.broadcast %cst_8 : f32 to vector<1x1xf32>
      %c16_i32 = arith.constant 16 : i32
      %20 = arith.muli %arg0, %c16_i32 : i32
      %21 = arith.sitofp %20 : i32 to f32
      %22 = vector.broadcast %21 : f32 to vector<1x1xf32>
      %23 = arith.addf %22, %19 : vector<1x1xf32>
      %24 = arith.divf %19, %23 : vector<1x1xf32>
      %c0_9 = arith.constant 0 : index
      %c0_10 = arith.constant 0 : index
      %25 = vector.load %arg4[%c0_9, %c0_10] : memref<1x256xf32, #tpu.memory_space<vmem>>, vector<1x256xf32>
      %26 = arith.subf %4, %25 : vector<1x256xf32>
      %c0_11 = arith.constant 0 : index
      %c0_12 = arith.constant 0 : index
      %27 = vector.load %arg4[%c0_11, %c0_12] : memref<1x256xf32, #tpu.memory_space<vmem>>, vector<1x256xf32>
      %28 = vector.broadcast %24 : vector<1x1xf32> to vector<1x256xf32>
      %29 = arith.mulf %26, %28 : vector<1x256xf32>
      %30 = arith.addf %27, %29 : vector<1x256xf32>
      %c0_13 = arith.constant 0 : index
      %c0_14 = arith.constant 0 : index
      %31 = vector.load %arg4[%c0_13, %c0_14] : memref<1x256xf32, #tpu.memory_space<vmem>>, vector<1x256xf32>
      tpu.vector_store %arg4[%c0_13, %c0_14], %30 {strides = array<i32>} : memref<1x256xf32, #tpu.memory_space<vmem>>, vector<1x256xf32>,
      %c0_15 = arith.constant 0 : index
      %c0_16 = arith.constant 0 : index
      %32 = vector.load %arg5[%c0_15, %c0_16] : memref<1x256xf32, #tpu.memory_space<vmem>>, vector<1x256xf32>
      %33 = arith.addf %32, %9 : vector<1x256xf32>
      %34 = arith.mulf %26, %26 : vector<1x256xf32>
      %35 = arith.mulf %22, %24 : vector<1x1xf32>
      %36 = vector.broadcast %35 : vector<1x1xf32> to vector<1x256xf32>
      %37 = arith.mulf %34, %36 : vector<1x256xf32>
      %38 = arith.addf %33, %37 : vector<1x256xf32>
      %c0_17 = arith.constant 0 : index
      %c0_18 = arith.constant 0 : index
      %39 = vector.load %arg5[%c0_17, %c0_18] : memref<1x256xf32, #tpu.memory_space<vmem>>, vector<1x256xf32>
      tpu.vector_store %arg5[%c0_17, %c0_18], %38 {strides = array<i32>} : memref<1x256xf32, #tpu.memory_space<vmem>>, vector<1x256xf32>,
    } else {
    }
    %c0_i32_6 = arith.constant 0 : i32
    %16 = arith.cmpi eq, %arg0, %c0_i32_6 : i32
    %17 = arith.extui %16 : i1 to i32
    %c0_i32_7 = arith.constant 0 : i32
    %18 = arith.cmpi ne, %17, %c0_i32_7 : i32
    scf.if %18 {
      %c0_8 = arith.constant 0 : index
      %c0_9 = arith.constant 0 : index
      %19 = vector.load %arg4[%c0_8, %c0_9] : memref<1x256xf32, #tpu.memory_space<vmem>>, vector<1x256xf32>
      %c0_10 = arith.constant 0 : index
      %c0_11 = arith.constant 0 : index
      %20 = vector.load %arg2[%c0_10, %c0_11] : memref<1x256xf32, #tpu.memory_space<vmem>>, vector<1x256xf32>
      tpu.vector_store %arg2[%c0_10, %c0_11], %19 {strides = array<i32>} : memref<1x256xf32, #tpu.memory_space<vmem>>, vector<1x256xf32>,
      %c0_12 = arith.constant 0 : index
      %c0_13 = arith.constant 0 : index
      %21 = vector.load %arg5[%c0_12, %c0_13] : memref<1x256xf32, #tpu.memory_space<vmem>>, vector<1x256xf32>
      %c0_14 = arith.constant 0 : index
      %c0_15 = arith.constant 0 : index
      %22 = vector.load %arg3[%c0_14, %c0_15] : memref<1x256xf32, #tpu.memory_space<vmem>>, vector<1x256xf32>
      tpu.vector_store %arg3[%c0_14, %c0_15], %21 {strides = array<i32>} : memref<1x256xf32, #tpu.memory_space<vmem>>, vector<1x256xf32>,
    } else {
    }
    return
  }
  func.func @transform_0(%arg0: i32) -> (i32, i32) {
    %c0_i32 = arith.constant 0 : i32
    %c0_i32_0 = arith.constant 0 : i32
    return %arg0, %c0_i32 : i32, i32
  }
  func.func @transform_1(%arg0: i32) -> (i32, i32) {
    %c0_i32 = arith.constant 0 : i32
    %c0_i32_0 = arith.constant 0 : i32
    %c0_i32_1 = arith.constant 0 : i32
    return %c0_i32, %c0_i32_0 : i32, i32
  }
  func.func @transform_2(%arg0: i32) -> (i32, i32) {
    %c0_i32 = arith.constant 0 : i32
    %c0_i32_0 = arith.constant 0 : i32
    %c0_i32_1 = arith.constant 0 : i32
    return %c0_i32, %c0_i32_0 : i32, i32
  }
}

module attributes {stable_mosaic.version = 11 : i64} {
  func.func @_bn_swish_conv_se_kernel(%arg0: i32, %arg1: memref<64x32xf32, #tpu.memory_space<vmem>>, %arg2: memref<1x32xf32, #tpu.memory_space<vmem>>, %arg3: memref<1x32xf32, #tpu.memory_space<vmem>>, %arg4: memref<288x32xf32, #tpu.memory_space<vmem>>, %arg5: memref<1x32xf32, #tpu.memory_space<vmem>>, %arg6: memref<32x4xf32, #tpu.memory_space<vmem>>, %arg7: memref<4x32xf32, #tpu.memory_space<vmem>>, %arg8: memref<64x32xf32, #tpu.memory_space<vmem>>, %arg9: memref<1x10x10x32xf32, #tpu.memory_space<vmem>>) attributes {dimension_semantics = [#tpu.dimension_semantics<parallel>], iteration_bounds = array<i64: 2>, scalar_prefetch = 0 : i64, scratch_operands = 1 : i64, tpu.core_type = #tpu.core_type<tc>, window_params = [{transform_indices = @transform_0, window_bounds = array<i64: 64, 32>}, {pipeline_mode = #tpu.pipeline_mode<synchronous>, transform_indices = @transform_1, window_bounds = array<i64: 1, 32>}, {pipeline_mode = #tpu.pipeline_mode<synchronous>, transform_indices = @transform_2, window_bounds = array<i64: 1, 32>}, {pipeline_mode = #tpu.pipeline_mode<synchronous>, transform_indices = @transform_3, window_bounds = array<i64: 288, 32>}, {pipeline_mode = #tpu.pipeline_mode<synchronous>, transform_indices = @transform_4, window_bounds = array<i64: 1, 32>}, {pipeline_mode = #tpu.pipeline_mode<synchronous>, transform_indices = @transform_5, window_bounds = array<i64: 32, 4>}, {pipeline_mode = #tpu.pipeline_mode<synchronous>, transform_indices = @transform_6, window_bounds = array<i64: 4, 32>}, {transform_indices = @transform_7, window_bounds = array<i64: 64, 32>}]} {
    %c0 = arith.constant 0 : index
    %c0_0 = arith.constant 0 : index
    %0 = vector.load %arg1[%c0, %c0_0] : memref<64x32xf32, #tpu.memory_space<vmem>>, vector<64x32xf32>
    %c0_1 = arith.constant 0 : index
    %c0_2 = arith.constant 0 : index
    %1 = vector.load %arg2[%c0_1, %c0_2] : memref<1x32xf32, #tpu.memory_space<vmem>>, vector<1x32xf32>
    %2 = vector.broadcast %1 : vector<1x32xf32> to vector<64x32xf32>
    %3 = arith.mulf %0, %2 : vector<64x32xf32>
    %c0_3 = arith.constant 0 : index
    %c0_4 = arith.constant 0 : index
    %4 = vector.load %arg3[%c0_3, %c0_4] : memref<1x32xf32, #tpu.memory_space<vmem>>, vector<1x32xf32>
    %5 = vector.broadcast %4 : vector<1x32xf32> to vector<64x32xf32>
    %6 = arith.addf %3, %5 : vector<64x32xf32>
    %7 = arith.negf %6 : vector<64x32xf32>
    %8 = math.exp %7 : vector<64x32xf32>
    %cst = arith.constant 1.000000e+00 : f32
    %9 = vector.broadcast %cst : f32 to vector<64x32xf32>
    %10 = arith.addf %9, %8 : vector<64x32xf32>
    %11 = arith.divf %9, %10 : vector<64x32xf32>
    %12 = arith.mulf %6, %11 : vector<64x32xf32>
    %cst_5 = arith.constant 0.000000e+00 : f32
    %13 = vector.broadcast %cst_5 : f32 to vector<1x1x10x32xf32>
    %c0_6 = arith.constant 0 : index
    %c0_7 = arith.constant 0 : index
    %c0_8 = arith.constant 0 : index
    %c0_9 = arith.constant 0 : index
    %14 = vector.load %arg9[%c0_6, %c0_7, %c0_8, %c0_9] : memref<1x10x10x32xf32, #tpu.memory_space<vmem>>, vector<1x1x10x32xf32>
    tpu.vector_store %arg9[%c0_6, %c0_7, %c0_8, %c0_9], %13 {strides = array<i32>} : memref<1x10x10x32xf32, #tpu.memory_space<vmem>>, vector<1x1x10x32xf32>,
    %cst_10 = arith.constant 0.000000e+00 : f32
    %15 = vector.broadcast %cst_10 : f32 to vector<1x1x10x32xf32>
    %c0_11 = arith.constant 0 : index
    %c9 = arith.constant 9 : index
    %c0_12 = arith.constant 0 : index
    %c0_13 = arith.constant 0 : index
    %16 = vector.load %arg9[%c0_11, %c9, %c0_12, %c0_13] : memref<1x10x10x32xf32, #tpu.memory_space<vmem>>, vector<1x1x10x32xf32>
    tpu.vector_store %arg9[%c0_11, %c9, %c0_12, %c0_13], %15 {strides = array<i32>} : memref<1x10x10x32xf32, #tpu.memory_space<vmem>>, vector<1x1x10x32xf32>,
    %cst_14 = arith.constant 0.000000e+00 : f32
    %17 = vector.broadcast %cst_14 : f32 to vector<1x10x1x32xf32>
    %c0_15 = arith.constant 0 : index
    %c0_16 = arith.constant 0 : index
    %c0_17 = arith.constant 0 : index
    %c0_18 = arith.constant 0 : index
    %18 = vector.load %arg9[%c0_15, %c0_16, %c0_17, %c0_18] : memref<1x10x10x32xf32, #tpu.memory_space<vmem>>, vector<1x10x1x32xf32>
    tpu.vector_store %arg9[%c0_15, %c0_16, %c0_17, %c0_18], %17 {strides = array<i32>} : memref<1x10x10x32xf32, #tpu.memory_space<vmem>>, vector<1x10x1x32xf32>,
    %cst_19 = arith.constant 0.000000e+00 : f32
    %19 = vector.broadcast %cst_19 : f32 to vector<1x10x1x32xf32>
    %c0_20 = arith.constant 0 : index
    %c0_21 = arith.constant 0 : index
    %c9_22 = arith.constant 9 : index
    %c0_23 = arith.constant 0 : index
    %20 = vector.load %arg9[%c0_20, %c0_21, %c9_22, %c0_23] : memref<1x10x10x32xf32, #tpu.memory_space<vmem>>, vector<1x10x1x32xf32>
    tpu.vector_store %arg9[%c0_20, %c0_21, %c9_22, %c0_23], %19 {strides = array<i32>} : memref<1x10x10x32xf32, #tpu.memory_space<vmem>>, vector<1x10x1x32xf32>,
    %21 = vector.shape_cast %12 : vector<64x32xf32> to vector<1x8x8x32xf32>
    %c0_24 = arith.constant 0 : index
    %c1 = arith.constant 1 : index
    %c1_25 = arith.constant 1 : index
    %c0_26 = arith.constant 0 : index
    %22 = vector.load %arg9[%c0_24, %c1, %c1_25, %c0_26] : memref<1x10x10x32xf32, #tpu.memory_space<vmem>>, vector<1x8x8x32xf32>
    tpu.vector_store %arg9[%c0_24, %c1, %c1_25, %c0_26], %21 {strides = array<i32>} : memref<1x10x10x32xf32, #tpu.memory_space<vmem>>, vector<1x8x8x32xf32>,
    %c0_27 = arith.constant 0 : index
    %c0_28 = arith.constant 0 : index
    %c0_29 = arith.constant 0 : index
    %c0_30 = arith.constant 0 : index
    %23 = vector.load %arg9[%c0_27, %c0_28, %c0_29, %c0_30] : memref<1x10x10x32xf32, #tpu.memory_space<vmem>>, vector<1x8x8x32xf32>
    %24 = vector.shape_cast %23 : vector<1x8x8x32xf32> to vector<64x32xf32>
    %c0_31 = arith.constant 0 : index
    %c0_32 = arith.constant 0 : index
    %25 = vector.load %arg4[%c0_31, %c0_32] : memref<288x32xf32, #tpu.memory_space<vmem>>, vector<32x32xf32>
    %cst_33 = arith.constant dense<0.000000e+00> : vector<64x32xf32>
    %26 = tpu.matmul %24, %25, %cst_33 {dimension_numbers = #tpu.dot_dimension_numbers<[1], [0], [0], [1], [0, 0, 1, 1], [], []>} : vector<64x32xf32>, vector<32x32xf32>, vector<64x32xf32> -> vector<64x32xf32>
    %c0_34 = arith.constant 0 : index
    %c0_35 = arith.constant 0 : index
    %c1_36 = arith.constant 1 : index
    %c0_37 = arith.constant 0 : index
    %27 = vector.load %arg9[%c0_34, %c0_35, %c1_36, %c0_37] : memref<1x10x10x32xf32, #tpu.memory_space<vmem>>, vector<1x8x8x32xf32>
    %28 = vector.shape_cast %27 : vector<1x8x8x32xf32> to vector<64x32xf32>
    %c32 = arith.constant 32 : index
    %c0_38 = arith.constant 0 : index
    %29 = vector.load %arg4[%c32, %c0_38] : memref<288x32xf32, #tpu.memory_space<vmem>>, vector<32x32xf32>
    %cst_39 = arith.constant dense<0.000000e+00> : vector<64x32xf32>
    %30 = tpu.matmul %28, %29, %cst_39 {dimension_numbers = #tpu.dot_dimension_numbers<[1], [0], [0], [1], [0, 0, 1, 1], [], []>} : vector<64x32xf32>, vector<32x32xf32>, vector<64x32xf32> -> vector<64x32xf32>
    %31 = arith.addf %26, %30 : vector<64x32xf32>
    %c0_40 = arith.constant 0 : index
    %c0_41 = arith.constant 0 : index
    %c2 = arith.constant 2 : index
    %c0_42 = arith.constant 0 : index
    %32 = vector.load %arg9[%c0_40, %c0_41, %c2, %c0_42] : memref<1x10x10x32xf32, #tpu.memory_space<vmem>>, vector<1x8x8x32xf32>
    %33 = vector.shape_cast %32 : vector<1x8x8x32xf32> to vector<64x32xf32>
    %c64 = arith.constant 64 : index
    %c0_43 = arith.constant 0 : index
    %34 = vector.load %arg4[%c64, %c0_43] : memref<288x32xf32, #tpu.memory_space<vmem>>, vector<32x32xf32>
    %cst_44 = arith.constant dense<0.000000e+00> : vector<64x32xf32>
    %35 = tpu.matmul %33, %34, %cst_44 {dimension_numbers = #tpu.dot_dimension_numbers<[1], [0], [0], [1], [0, 0, 1, 1], [], []>} : vector<64x32xf32>, vector<32x32xf32>, vector<64x32xf32> -> vector<64x32xf32>
    %36 = arith.addf %31, %35 : vector<64x32xf32>
    %c0_45 = arith.constant 0 : index
    %c1_46 = arith.constant 1 : index
    %c0_47 = arith.constant 0 : index
    %c0_48 = arith.constant 0 : index
    %37 = vector.load %arg9[%c0_45, %c1_46, %c0_47, %c0_48] : memref<1x10x10x32xf32, #tpu.memory_space<vmem>>, vector<1x8x8x32xf32>
    %38 = vector.shape_cast %37 : vector<1x8x8x32xf32> to vector<64x32xf32>
    %c96 = arith.constant 96 : index
    %c0_49 = arith.constant 0 : index
    %39 = vector.load %arg4[%c96, %c0_49] : memref<288x32xf32, #tpu.memory_space<vmem>>, vector<32x32xf32>
    %cst_50 = arith.constant dense<0.000000e+00> : vector<64x32xf32>
    %40 = tpu.matmul %38, %39, %cst_50 {dimension_numbers = #tpu.dot_dimension_numbers<[1], [0], [0], [1], [0, 0, 1, 1], [], []>} : vector<64x32xf32>, vector<32x32xf32>, vector<64x32xf32> -> vector<64x32xf32>
    %41 = arith.addf %36, %40 : vector<64x32xf32>
    %c0_51 = arith.constant 0 : index
    %c1_52 = arith.constant 1 : index
    %c1_53 = arith.constant 1 : index
    %c0_54 = arith.constant 0 : index
    %42 = vector.load %arg9[%c0_51, %c1_52, %c1_53, %c0_54] : memref<1x10x10x32xf32, #tpu.memory_space<vmem>>, vector<1x8x8x32xf32>
    %43 = vector.shape_cast %42 : vector<1x8x8x32xf32> to vector<64x32xf32>
    %c128 = arith.constant 128 : index
    %c0_55 = arith.constant 0 : index
    %44 = vector.load %arg4[%c128, %c0_55] : memref<288x32xf32, #tpu.memory_space<vmem>>, vector<32x32xf32>
    %cst_56 = arith.constant dense<0.000000e+00> : vector<64x32xf32>
    %45 = tpu.matmul %43, %44, %cst_56 {dimension_numbers = #tpu.dot_dimension_numbers<[1], [0], [0], [1], [0, 0, 1, 1], [], []>} : vector<64x32xf32>, vector<32x32xf32>, vector<64x32xf32> -> vector<64x32xf32>
    %46 = arith.addf %41, %45 : vector<64x32xf32>
    %c0_57 = arith.constant 0 : index
    %c1_58 = arith.constant 1 : index
    %c2_59 = arith.constant 2 : index
    %c0_60 = arith.constant 0 : index
    %47 = vector.load %arg9[%c0_57, %c1_58, %c2_59, %c0_60] : memref<1x10x10x32xf32, #tpu.memory_space<vmem>>, vector<1x8x8x32xf32>
    %48 = vector.shape_cast %47 : vector<1x8x8x32xf32> to vector<64x32xf32>
    %c160 = arith.constant 160 : index
    %c0_61 = arith.constant 0 : index
    %49 = vector.load %arg4[%c160, %c0_61] : memref<288x32xf32, #tpu.memory_space<vmem>>, vector<32x32xf32>
    %cst_62 = arith.constant dense<0.000000e+00> : vector<64x32xf32>
    %50 = tpu.matmul %48, %49, %cst_62 {dimension_numbers = #tpu.dot_dimension_numbers<[1], [0], [0], [1], [0, 0, 1, 1], [], []>} : vector<64x32xf32>, vector<32x32xf32>, vector<64x32xf32> -> vector<64x32xf32>
    %51 = arith.addf %46, %50 : vector<64x32xf32>
    %c0_63 = arith.constant 0 : index
    %c2_64 = arith.constant 2 : index
    %c0_65 = arith.constant 0 : index
    %c0_66 = arith.constant 0 : index
    %52 = vector.load %arg9[%c0_63, %c2_64, %c0_65, %c0_66] : memref<1x10x10x32xf32, #tpu.memory_space<vmem>>, vector<1x8x8x32xf32>
    %53 = vector.shape_cast %52 : vector<1x8x8x32xf32> to vector<64x32xf32>
    %c192 = arith.constant 192 : index
    %c0_67 = arith.constant 0 : index
    %54 = vector.load %arg4[%c192, %c0_67] : memref<288x32xf32, #tpu.memory_space<vmem>>, vector<32x32xf32>
    %cst_68 = arith.constant dense<0.000000e+00> : vector<64x32xf32>
    %55 = tpu.matmul %53, %54, %cst_68 {dimension_numbers = #tpu.dot_dimension_numbers<[1], [0], [0], [1], [0, 0, 1, 1], [], []>} : vector<64x32xf32>, vector<32x32xf32>, vector<64x32xf32> -> vector<64x32xf32>
    %56 = arith.addf %51, %55 : vector<64x32xf32>
    %c0_69 = arith.constant 0 : index
    %c2_70 = arith.constant 2 : index
    %c1_71 = arith.constant 1 : index
    %c0_72 = arith.constant 0 : index
    %57 = vector.load %arg9[%c0_69, %c2_70, %c1_71, %c0_72] : memref<1x10x10x32xf32, #tpu.memory_space<vmem>>, vector<1x8x8x32xf32>
    %58 = vector.shape_cast %57 : vector<1x8x8x32xf32> to vector<64x32xf32>
    %c224 = arith.constant 224 : index
    %c0_73 = arith.constant 0 : index
    %59 = vector.load %arg4[%c224, %c0_73] : memref<288x32xf32, #tpu.memory_space<vmem>>, vector<32x32xf32>
    %cst_74 = arith.constant dense<0.000000e+00> : vector<64x32xf32>
    %60 = tpu.matmul %58, %59, %cst_74 {dimension_numbers = #tpu.dot_dimension_numbers<[1], [0], [0], [1], [0, 0, 1, 1], [], []>} : vector<64x32xf32>, vector<32x32xf32>, vector<64x32xf32> -> vector<64x32xf32>
    %61 = arith.addf %56, %60 : vector<64x32xf32>
    %c0_75 = arith.constant 0 : index
    %c2_76 = arith.constant 2 : index
    %c2_77 = arith.constant 2 : index
    %c0_78 = arith.constant 0 : index
    %62 = vector.load %arg9[%c0_75, %c2_76, %c2_77, %c0_78] : memref<1x10x10x32xf32, #tpu.memory_space<vmem>>, vector<1x8x8x32xf32>
    %63 = vector.shape_cast %62 : vector<1x8x8x32xf32> to vector<64x32xf32>
    %c256 = arith.constant 256 : index
    %c0_79 = arith.constant 0 : index
    %64 = vector.load %arg4[%c256, %c0_79] : memref<288x32xf32, #tpu.memory_space<vmem>>, vector<32x32xf32>
    %cst_80 = arith.constant dense<0.000000e+00> : vector<64x32xf32>
    %65 = tpu.matmul %63, %64, %cst_80 {dimension_numbers = #tpu.dot_dimension_numbers<[1], [0], [0], [1], [0, 0, 1, 1], [], []>} : vector<64x32xf32>, vector<32x32xf32>, vector<64x32xf32> -> vector<64x32xf32>
    %66 = arith.addf %61, %65 : vector<64x32xf32>
    %c0_81 = arith.constant 0 : index
    %c0_82 = arith.constant 0 : index
    %67 = vector.load %arg5[%c0_81, %c0_82] : memref<1x32xf32, #tpu.memory_space<vmem>>, vector<1x32xf32>
    %68 = vector.broadcast %67 : vector<1x32xf32> to vector<64x32xf32>
    %69 = arith.addf %66, %68 : vector<64x32xf32>
    %70 = vector.shape_cast %69 : vector<64x32xf32> to vector<1x64x32xf32>
    %cst_83 = arith.constant dense<0.000000e+00> : vector<1x32xf32>
    %71 = vector.multi_reduction <add>, %70, %cst_83 [1] : vector<1x64x32xf32> to vector<1x32xf32>
    %cst_84 = arith.constant 6.400000e+01 : f32
    %72 = vector.broadcast %cst_84 : f32 to vector<1x32xf32>
    %73 = arith.divf %71, %72 : vector<1x32xf32>
    %c0_85 = arith.constant 0 : index
    %c0_86 = arith.constant 0 : index
    %74 = vector.load %arg6[%c0_85, %c0_86] : memref<32x4xf32, #tpu.memory_space<vmem>>, vector<32x4xf32>
    %cst_87 = arith.constant dense<0.000000e+00> : vector<1x4xf32>
    %75 = tpu.matmul %73, %74, %cst_87 {dimension_numbers = #tpu.dot_dimension_numbers<[1], [0], [0], [1], [0, 0, 1, 1], [], []>} : vector<1x32xf32>, vector<32x4xf32>, vector<1x4xf32> -> vector<1x4xf32>
    %cst_88 = arith.constant 0.000000e+00 : f32
    %76 = vector.broadcast %cst_88 : f32 to vector<1x4xf32>
    %77 = arith.maximumf %75, %76 : vector<1x4xf32>
    %c0_89 = arith.constant 0 : index
    %c0_90 = arith.constant 0 : index
    %78 = vector.load %arg7[%c0_89, %c0_90] : memref<4x32xf32, #tpu.memory_space<vmem>>, vector<4x32xf32>
    %cst_91 = arith.constant dense<0.000000e+00> : vector<1x32xf32>
    %79 = tpu.matmul %77, %78, %cst_91 {dimension_numbers = #tpu.dot_dimension_numbers<[1], [0], [0], [1], [0, 0, 1, 1], [], []>} : vector<1x4xf32>, vector<4x32xf32>, vector<1x32xf32> -> vector<1x32xf32>
    %80 = arith.negf %79 : vector<1x32xf32>
    %81 = math.exp %80 : vector<1x32xf32>
    %cst_92 = arith.constant 1.000000e+00 : f32
    %82 = vector.broadcast %cst_92 : f32 to vector<1x32xf32>
    %83 = arith.addf %82, %81 : vector<1x32xf32>
    %84 = arith.divf %82, %83 : vector<1x32xf32>
    %85 = vector.shape_cast %84 : vector<1x32xf32> to vector<1x1x32xf32>
    %86 = vector.broadcast %85 : vector<1x1x32xf32> to vector<1x64x32xf32>
    %87 = arith.mulf %70, %86 : vector<1x64x32xf32>
    %88 = vector.shape_cast %87 : vector<1x64x32xf32> to vector<64x32xf32>
    %c0_93 = arith.constant 0 : index
    %c0_94 = arith.constant 0 : index
    %89 = vector.load %arg8[%c0_93, %c0_94] : memref<64x32xf32, #tpu.memory_space<vmem>>, vector<64x32xf32>
    tpu.vector_store %arg8[%c0_93, %c0_94], %88 {strides = array<i32>} : memref<64x32xf32, #tpu.memory_space<vmem>>, vector<64x32xf32>,
    return
  }
  func.func @transform_0(%arg0: i32) -> (i32, i32) {
    %c0_i32 = arith.constant 0 : i32
    %c0_i32_0 = arith.constant 0 : i32
    return %arg0, %c0_i32 : i32, i32
  }
  func.func @transform_1(%arg0: i32) -> (i32, i32) {
    %c0_i32 = arith.constant 0 : i32
    %c0_i32_0 = arith.constant 0 : i32
    %c0_i32_1 = arith.constant 0 : i32
    return %c0_i32, %c0_i32_0 : i32, i32
  }
  func.func @transform_2(%arg0: i32) -> (i32, i32) {
    %c0_i32 = arith.constant 0 : i32
    %c0_i32_0 = arith.constant 0 : i32
    %c0_i32_1 = arith.constant 0 : i32
    return %c0_i32, %c0_i32_0 : i32, i32
  }
  func.func @transform_3(%arg0: i32) -> (i32, i32) {
    %c0_i32 = arith.constant 0 : i32
    %c0_i32_0 = arith.constant 0 : i32
    %c0_i32_1 = arith.constant 0 : i32
    return %c0_i32, %c0_i32_0 : i32, i32
  }
  func.func @transform_4(%arg0: i32) -> (i32, i32) {
    %c0_i32 = arith.constant 0 : i32
    %c0_i32_0 = arith.constant 0 : i32
    %c0_i32_1 = arith.constant 0 : i32
    return %c0_i32, %c0_i32_0 : i32, i32
  }
  func.func @transform_5(%arg0: i32) -> (i32, i32) {
    %c0_i32 = arith.constant 0 : i32
    %c0_i32_0 = arith.constant 0 : i32
    %c0_i32_1 = arith.constant 0 : i32
    return %c0_i32, %c0_i32_0 : i32, i32
  }
  func.func @transform_6(%arg0: i32) -> (i32, i32) {
    %c0_i32 = arith.constant 0 : i32
    %c0_i32_0 = arith.constant 0 : i32
    %c0_i32_1 = arith.constant 0 : i32
    return %c0_i32, %c0_i32_0 : i32, i32
  }
  func.func @transform_7(%arg0: i32) -> (i32, i32) {
    %c0_i32 = arith.constant 0 : i32
    %c0_i32_0 = arith.constant 0 : i32
    return %arg0, %c0_i32 : i32, i32
  }
}

</mosaic_0001>

<bundles_post_ra>
// kernel: encoder_conv_se_block.4
= control target key start
LH: loop header
LB: loop body
LE: loop exit
PB: predicated region body
PF: predicated region fallthrough
CT: control target
= control target key end

     0   :  { %s102_s0 = inlined_call_operand.vmem [shape: f32[16,128], index: 0, kind: input, shape index: {}]   ;;  %s103_s1 = inlined_call_operand.vmem [shape: f32[1,128], index: 1, kind: output, shape index: {0}]   ;;  %s104_s2 = inlined_call_operand.vmem [shape: f32[1,128], index: 2, kind: output, shape index: {1}]  }
   0x1   :  { %v10_v0 = vld [vmem:[%s102_s0] sm:$0xff]  ;;  %v11_v1 = vld [vmem:[%s102_s0 + $0x8] sm:$0xff] }
   0x2   :  { %v12_v2 = vadd.f32 %v11_v1, %v10_v0 }
   0x4   :  { %v13_v3 = vrot.slane %v12_v2, 4 }
   0x6   :  { %v14_v4 = vadd.f32 %v13_v3, %v12_v2 }
   0x8   :  { %v15_v5 = vrot.slane %v14_v4, 2 }
   0xa   :  { %v16_v6 = vadd.f32 %v15_v5, %v14_v4 }
   0xc   :  { %v17_v7 = vrot.slane %v16_v6, 1 }
   0xe   :  { %v18_v8 = vadd.f32 %v17_v7, %v16_v6 }
  0x10   :  { %v20_v9 = vmul.f32 0.0625, %v18_v8 }
  0x12   :  { %36 = vst [vmem:[#allocation2] sm:$0x1] %v20_v9  ;;  %v21_v10 = vsub.f32 %v10_v0, %v20_v9  ;;  %v22_v11 = vsub.f32 %v11_v1, %v20_v9 }
  0x14   :  { %v23_v12 = vmul.f32 %v21_v10, %v21_v10  ;;  %v24_v13 = vmul.f32 %v22_v11, %v22_v11 }
  0x16   :  { %v25_v14 = vadd.f32 %v24_v13, %v23_v12 }
  0x18   :  { %v26_v15 = vrot.slane %v25_v14, 4 }
  0x19   :  { %v63_v16 = vld [vmem:[#allocation2] sm:$0x1] }
  0x1a   :  { %v27_v17 = vadd.f32 %v26_v15, %v25_v14  ;;  %64 = vst [vmem:[%s103_s1] sm:$0x1] %v63_v16 }
  0x1c   :  { %v28_v18 = vrot.slane %v27_v17, 2 }
  0x1e   :  { %v29_v19 = vadd.f32 %v28_v18, %v27_v17 }
  0x20   :  { %v30_v20 = vrot.slane %v29_v19, 1 }
  0x22   :  { %v31_v21 = vadd.f32 %v30_v20, %v29_v19 }
  0x24   :  { %37 = vst [vmem:[#allocation3] sm:$0x1] %v31_v21 }
  0x2b   :  { %v65_v22 = vld [vmem:[#allocation3] sm:$0x1] }
  0x2c   :  { %66 = vst [vmem:[%s104_s2] sm:$0x1] %v65_v22 }

// kernel: encoder_conv_se_block.6
= control target key start
LH: loop header
LB: loop body
LE: loop exit
PB: predicated region body
PF: predicated region fallthrough
CT: control target
= control target key end

     0   :  { %v214_v12 = vmov 1966171168   ;;  %v63_v14 = vlaneseq  ;;  %s260_s0 = inlined_call_operand.vmem [shape: f32[16,256], index: 0, kind: input, shape index: {}]   ;;  %s261_s1 = inlined_call_operand.vmem [shape: f32[1,256], index: 1, kind: output, shape index: {0}]   ;;  %s262_s2 = inlined_call_operand.vmem [shape: f32[1,256], index: 2, kind: output, shape index: {1}]  }
   0x1   :  { %v10_v0 = vld [vmem:[%s260_s0] sm:$0xff]  ;;  %v11_v1 = vld [vmem:[%s260_s0 + $0x8] sm:$0xff]  ;;  %v12_v2 = vld [vmem:[%s260_s0 + $0x10] sm:$0xff]  ;;  %v61_v13 = vunpack.c.l.s4 %v214_v12 }
   0x2   :  { %v13_v3 = vld [vmem:[%s260_s0 + $0x18] sm:$0xff]  ;;  %v14_v4 = vadd.f32 %v12_v2, %v10_v0  ;;  %v64_v20 = vshrl.u32 %v63_v14, 7  ;;  %vm242_vm0 = vcmp.lt.s32.totalorder %v63_v14, 256 }
   0x3   :  { %v21_v5 = vadd.f32 %v13_v3, %v11_v1  ;;  %v62_v19 = vunpack.c.0.s8 %v61_v13 }
   0x4   :  { %v15_v6 = vrot.slane %v14_v4, 4 }
   0x5   :  { %v22_v7 = vrot.slane %v21_v5, 4  ;;  %v65_v25 = vsub.s32 %v62_v19, %v64_v20 }
   0x6   :  { %v16_v8 = vadd.f32 %v15_v6, %v14_v4 }
   0x7   :  { %v23_v9 = vadd.f32 %v22_v7, %v21_v5 }
   0x8   :  { %v17_v10 = vrot.slane %v16_v8, 2 }
   0x9   :  { %v24_v11 = vrot.slane %v23_v9, 2 }
   0xa   :  { %v18_v15 = vadd.f32 %v17_v10, %v16_v8 }
   0xb   :  { %v25_v16 = vadd.f32 %v24_v11, %v23_v9 }
   0xc   :  { %v19_v17 = vrot.slane %v18_v15, 1 }
   0xd   :  { %v26_v18 = vrot.slane %v25_v16, 1 }
   0xe   :  { %v20_v21 = vadd.f32 %v19_v17, %v18_v15 }
   0xf   :  { %v27_v22 = vadd.f32 %v26_v18, %v25_v16 }
  0x10   :  { %v29_v23 = vmul.f32 0.0625, %v20_v21 }
  0x11   :  { %v30_v24 = vmul.f32 0.0625, %v27_v22 }
  0x12   :  { %v31_v26 = vsub.f32 %v10_v0, %v29_v23  ;;  %v33_v27 = vsub.f32 %v12_v2, %v29_v23 }
  0x13   :  { %v32_v28 = vsub.f32 %v11_v1, %v30_v24  ;;  %v34_v29 = vsub.f32 %v13_v3, %v30_v24  ;;  %v59_v30 = vcombine.low %v29_v23, %v30_v24 }
  0x14   :  { %v35_v31 = vmul.f32 %v31_v26, %v31_v26  ;;  %v37_v32 = vmul.f32 %v33_v27, %v33_v27 }
  0x15   :  { %v36_v33 = vmul.f32 %v32_v28, %v32_v28  ;;  %v38_v34 = vmul.f32 %v34_v29, %v34_v29  ;;  %v66_v35 = vrot.slane %v59_v30, %v65_v25 }
  0x16   :  { %v39_v37 = vadd.f32 %v37_v32, %v35_v31 }
  0x17   :  { %v73_v38 = vrot.slane %v66_v35, %v65_v25  ;;  %v46_v39 = vadd.f32 %v38_v34, %v36_v33 }
  0x18   :  { %v40_v40 = vrot.slane %v39_v37, 4 }
  0x19   :  { %79 = vst.msk [vmem:[#allocation2] sm:$0x3] %vm242_vm0, %v73_v38  ;;  %v47_v41 = vrot.slane %v46_v39, 4 }
  0x1a   :  { %v41_v42 = vadd.f32 %v40_v40, %v39_v37 }
  0x1b   :  { %v48_v43 = vadd.f32 %v47_v41, %v46_v39 }
  0x1c   :  { %v42_v44 = vrot.slane %v41_v42, 2 }
  0x1d   :  { %v49_v45 = vrot.slane %v48_v43, 2 }
  0x1e   :  { %v43_v46 = vadd.f32 %v42_v44, %v41_v42 }
  0x1f   :  { %v50_v47 = vadd.f32 %v49_v45, %v48_v43 }
  0x20   :  { %v44_v48 = vrot.slane %v43_v46, 1  ;;  %v197_v49 = vld [vmem:[#allocation2] sm:$0x3] }
  0x21   :  { %v51_v50 = vrot.slane %v50_v47, 1  ;;  %202 = vst.msk [vmem:[%s261_s1] sm:$0x3] %vm242_vm0, %v197_v49 }
  0x22   :  { %v45_v51 = vadd.f32 %v44_v48, %v43_v46 }
  0x23   :  { %v52_v52 = vadd.f32 %v51_v50, %v50_v47 }
  0x25   :  { %v82_v53 = vcombine.low %v45_v51, %v52_v52 }
  0x27   :  { %v89_v54 = vrot.slane %v82_v53, %v65_v25 }
  0x29   :  { %v96_v55 = vrot.slane %v89_v54, %v65_v25 }
  0x2b   :  { %98 = vst.msk [vmem:[#allocation3] sm:$0x3] %vm242_vm0, %v96_v55 }
  0x32   :  { %v203_v56 = vld [vmem:[#allocation3] sm:$0x3] }
  0x33   :  { %204 = vst.msk [vmem:[%s262_s2] sm:$0x3] %vm242_vm0, %v203_v56 }

// kernel: encoder_conv_se_block.5
= control target key start
LH: loop header
LB: loop body
LE: loop exit
PB: predicated region body
PF: predicated region fallthrough
CT: control target
= control target key end

     0   :  { %s2209_s15 = smov 0   ;;  %s2489_s0 = inlined_call_operand.vmem [shape: f32[128,16], index: 0, kind: input, shape index: {}]   ;;  %s2490_s1 = inlined_call_operand.vmem [shape: f32[1,16], index: 1, kind: input, shape index: {}]   ;;  %s2491_s2 = inlined_call_operand.vmem [shape: f32[1,16], index: 2, kind: input, shape index: {}]   ;;  %s2492_s3 = inlined_call_operand.vmem [shape: f32[144,32], index: 3, kind: input, shape index: {}]   ;;  %s2493_s4 = inlined_call_operand.vmem [shape: f32[128,32], index: 4, kind: output, shape index: {}]  }
   0x1 LB: > { %s1705_s16 = sadd.s32 4294967295, %s2181_s15   ;;  %p1709_p0 = scmp.ge.s32.totalorder %s2181_s15, 1  ;;  %s2181_s15 = sphi %s2209_s15, %s14_s15  }
   0x2   : > { %p163_p1 = scmp.lt.s32.totalorder %s2181_s15, 3 }
   0x4   : > { %p164_p2 = pnand %p1709_p0, %p163_p1 }
   0x5   : > { %v350_v0 = vld [vmem:[%s2492_s3 + $0x10] sm:$0xff] (!%p164_p2)  ;;  %v351_v1 = vld [vmem:[%s2492_s3 + $0x18] sm:$0xff] (!%p164_p2)  ;;  %v912_v2 = vld [vmem:[%s2492_s3 + $0x40] sm:$0xff] (!%p164_p2)  ;;  %vm295_vm0 = vcmask (!%p164_p2), 130048   ;;  %vm297_vm1 = vcmask (!%p164_p2), 123904   ;;  %v2183_v5 = vmov (!%p164_p2), 0.0  }
   0x6   : > { %167 = sbr.rel (%p164_p2) target bundleno = 342 (0x156), region = 36  ;;  %v2032_v3 = vpack.c.bf16 (!%p164_p2), %v351_v1, %v350_v0  ;;  %v913_v4 = vld [vmem:[%s2492_s3 + $0x48] sm:$0xff] (!%p164_p2)  ;;  %296 = vst.msk [vmem:[#allocation2] sm:$0xff] (!%p164_p2), %vm295_vm0, %v2183_v5  ;;  %vm302_vm2 = vcmask (!%p164_p2), 122880   ;;  %300 = vst.msk [vmem:[#allocation2 + $0x90] sm:$0xff] (!%p164_p2), %vm295_vm0, %v2183_v5  ;;  %s2231_s25 = sshll.u32 (!%p164_p2), %s1705_s16, 3 }
   0x7   : > { %298 = vst.msk [vmem:[#allocation2 + $0x8] sm:$0x3] (!%p164_p2), %vm297_vm1, %v2183_v5  ;;  %301 = vst.msk [vmem:[#allocation2 + $0x98] sm:$0x3] (!%p164_p2), %vm297_vm1, %v2183_v5  ;;  %v340_v6 = vld [vmem:[%s2492_s3] sm:$0xff] (!%p164_p2)  ;;  %v2236_v7 = vpack.c.bf16 (!%p164_p2), %v913_v4, %v912_v2  ;;  %p190_p3 = scmp.lt.s32.totalorder (!%p164_p2), %s2231_s25, 15 }
   0x8   : > { %313 = vst.msk [vmem:[#allocation2 + $0x9] sm:$0x1] (!%p164_p2), %vm302_vm2, %v2183_v5  ;;  %303 = vst.msk [vmem:[#allocation2] sm:$0x1] (!%p164_p2), %vm302_vm2, %v2183_v5  ;;  %v341_v8 = vld [vmem:[%s2492_s3 + $0x8] sm:$0xff] (!%p164_p2)  ;;  %v1059_v9 = vld [vmem:[%s2492_s3 + $0x50] sm:$0xff] (!%p164_p2)  ;;  %2033 = vmatprep.subr.bf16.mxu1 (!%p164_p2), %v2032_v3 }
   0x9   : > { %304 = vst.msk [vmem:[#allocation2 + $0x10] sm:$0x1] (!%p164_p2), %vm302_vm2, %v2183_v5  ;;  %305 = vst.msk [vmem:[#allocation2 + $0x20] sm:$0x1] (!%p164_p2), %vm302_vm2, %v2183_v5  ;;  %v2265_v10 = vpack.c.bf16 (!%p164_p2), %v341_v8, %v340_v6  ;;  %v1060_v11 = vld [vmem:[%s2492_s3 + $0x58] sm:$0xff] (!%p164_p2)  ;;  %2049 = vmatprep.subr.bf16.mxu0 (!%p164_p2), %v2236_v7  ;;  %2035 = vmatpush3.bf16.msra.mxu1 (!%p164_p2), %v2032_v3  ;;  %vm1640_vm3 = vcmask (!%p164_p2), 261120  }
   0xa   : > { %306 = vst.msk [vmem:[#allocation2 + $0x30] sm:$0x1] (!%p164_p2), %vm302_vm2, %v2183_v5  ;;  %307 = vst.msk [vmem:[#allocation2 + $0x40] sm:$0x1] (!%p164_p2), %vm302_vm2, %v2183_v5  ;;  %v2274_v12 = vpack.c.bf16 (!%p164_p2), %v1060_v11, %v1059_v9  ;;  %2051 = vmatpush3.bf16.msra.mxu0 (!%p164_p2), %v2236_v7  ;;  %v1714_v13 = vld [vmem:[%s2490_s1] ss:$0 sm:$0xff] (!%p164_p2) }
   0xb   : > { %308 = vst.msk [vmem:[#allocation2 + $0x50] sm:$0x1] (!%p164_p2), %vm302_vm2, %v2183_v5  ;;  %309 = vst.msk [vmem:[#allocation2 + $0x60] sm:$0x1] (!%p164_p2), %vm302_vm2, %v2183_v5  ;;  %2037 = vmatprep.subr.bf16.mxu1 (!%p164_p2), %v2265_v10  ;;  %v1715_v14 = vld [vmem:[%s2491_s2] ss:$0 sm:$0xff] (!%p164_p2) }
   0xc   : > { %310 = vst.msk [vmem:[#allocation2 + $0x70] sm:$0x1] (!%p164_p2), %vm302_vm2, %v2183_v5  ;;  %311 = vst.msk [vmem:[#allocation2 + $0x80] sm:$0x1] (!%p164_p2), %vm302_vm2, %v2183_v5  ;;  %2053 = vmatprep.subr.bf16.mxu0 (!%p164_p2), %v2274_v12 }
   0xd   : > { %314 = vst.msk [vmem:[#allocation2 + $0x19] sm:$0x1] %vm302_vm2, %v2183_v5  ;;  %315 = vst.msk [vmem:[#allocation2 + $0x29] sm:$0x1] %vm302_vm2, %v2183_v5  ;;  %s2495_s25 = smov (!%p190_p3, %s2231_s25), 15 }
   0xe   : > { %316 = vst.msk [vmem:[#allocation2 + $0x39] sm:$0x1] %vm302_vm2, %v2183_v5  ;;  %317 = vst.msk [vmem:[#allocation2 + $0x49] sm:$0x1] %vm302_vm2, %v2183_v5  ;;  %s1711_s8 = sshll.u32 %s2495_s25, 3  ;;  %v342_v15 = vld [vmem:[#allocation2 + $0x1] sm:$0xff] }
   0xf   : > { %318 = vst.msk [vmem:[#allocation2 + $0x59] sm:$0x1] %vm302_vm2, %v2183_v5  ;;  %319 = vst.msk [vmem:[#allocation2 + $0x69] sm:$0x1] %vm302_vm2, %v2183_v5  ;;  %s193_s13 = scalar_lea.vmem %s2489_s0, %s1711_s8  ;;  %1892 = vmatprep.mubr.msk.f32.mxu1 %vm295_vm0, %v342_v15  ;;  %s199_s16 = scalar_lea.vmem %s2493_s4, %s1711_s8 }
  0x10   : > { %320 = vst.msk [vmem:[#allocation2 + $0x79] sm:$0x1] %vm302_vm2, %v2183_v5  ;;  %321 = vst.msk [vmem:[#allocation2 + $0x89] sm:$0x1] %vm302_vm2, %v2183_v5  ;;  %v201_v16 = vld [vmem:[%s193_s13] sm:$0xff]  ;;  %v202_v17 = vld [vmem:[%s193_s13 + $0x8] sm:$0xff] }
  0x11   : > { %322 = vst.msk [vmem:[#allocation2 + $0x99] sm:$0x1] %vm302_vm2, %v2183_v5  ;;  %312 = vst.msk [vmem:[#allocation2 + $0x90] sm:$0x1] %vm302_vm2, %v2183_v5  ;;  %v216_v18 = vmul.f32 %v1714_v13, %v201_v16  ;;  %v217_v19 = vmul.f32 %v1714_v13, %v202_v17  ;;  %v203_v20 = vld [vmem:[%s193_s13 + $0x10] sm:$0xff]  ;;  %v204_v21 = vld [vmem:[%s193_s13 + $0x18] sm:$0xff] }
  0x12   : > { %v205_v22 = vld [vmem:[%s193_s13 + $0x20] sm:$0xff]  ;;  %v218_v23 = vmul.f32 %v1714_v13, %v203_v20  ;;  %v219_v24 = vmul.f32 %v1714_v13, %v204_v21  ;;  %v206_v26 = vld [vmem:[%s193_s13 + $0x28] sm:$0xff]  ;;  %v207_v27 = vld [vmem:[%s193_s13 + $0x30] sm:$0xff] }
  0x13   : > { %v220_v25 = vmul.f32 %v1714_v13, %v205_v22  ;;  %v231_v28 = vadd.f32 %v1715_v14, %v216_v18  ;;  %v232_v29 = vadd.f32 %v1715_v14, %v217_v19  ;;  %v221_v30 = vmul.f32 %v1714_v13, %v206_v26  ;;  %v208_v32 = vld [vmem:[%s193_s13 + $0x38] sm:$0xff]  ;;  %v1207_v17 = vld [vmem:[%s2492_s3 + $0x60] sm:$0xff]  ;;  %v1208_v18 = vld [vmem:[%s2492_s3 + $0x68] sm:$0xff] }
  0x14   : > { %v222_v31 = vmul.f32 %v1714_v13, %v207_v27  ;;  %v233_v33 = vadd.f32 %v1715_v14, %v218_v23  ;;  %v234_v34 = vadd.f32 %v1715_v14, %v219_v24  ;;  %v223_v36 = vmul.f32 %v1714_v13, %v208_v32  ;;  %v618_v20 = vld [vmem:[%s2492_s3 + $0x20] sm:$0xff]  ;;  %v619_v21 = vld [vmem:[%s2492_s3 + $0x28] sm:$0xff] }
  0x15   : > { %v235_v35 = vadd.f32 %v1715_v14, %v220_v25  ;;  %v1716_v37 = vmul.f32 -1.442695, %v231_v28  ;;  %v1717_v38 = vmul.f32 -1.442695, %v232_v29  ;;  %v236_v39 = vadd.f32 %v1715_v14, %v221_v30 }
  0x16   : > { %v237_v40 = vadd.f32 %v1715_v14, %v222_v31  ;;  %v1718_v41 = vmul.f32 -1.442695, %v233_v33  ;;  %v1719_v42 = vmul.f32 -1.442695, %v234_v34  ;;  %v238_v43 = vadd.f32 %v1715_v14, %v223_v36 }
  0x17   : > { %2143 = vpow2.f32 %v1716_v37  ;;  %v1720_v44 = vmul.f32 -1.442695, %v235_v35  ;;  %v1721_v45 = vmul.f32 -1.442695, %v236_v39  ;;  %v2056_v24 = vpack.c.bf16 %v1208_v18, %v1207_v17  ;;  %v332_v37 = vld [vmem:[#allocation2] sm:$0xff] }
  0x18   : > { %2145 = vpow2.f32 %v1717_v38  ;;  %v1722_v46 = vmul.f32 -1.442695, %v237_v40  ;;  %v1723_v47 = vmul.f32 -1.442695, %v238_v43  ;;  %v2040_v26 = vpack.c.bf16 %v619_v21, %v618_v20 }
  0x19   : > { %2147 = vpow2.f32 %v1718_v41 }
  0x1a   : > { %2149 = vpow2.f32 %v1719_v42 }
  0x1b   : > { %2151 = vpow2.f32 %v1720_v44 }
  0x1c   : > { %2153 = vpow2.f32 %v1721_v45 }
  0x1d   : > { %2155 = vpow2.f32 %v1722_v46 }
  0x1e   : > { %2157 = vpow2.f32 %v1723_v47 }
  0x21   : > { %v2144_v48 = vpop.eup %2143 }
  0x22   : > { %v2146_v49 = vpop.eup %2145  ;;  %v263_v50 = vadd.f32 1.0, %v2144_v48 }
  0x23   : > { %v2148_v51 = vpop.eup %2147  ;;  %v264_v52 = vadd.f32 1.0, %v2146_v49  ;;  %v1501_v49 = vld [vmem:[%s2492_s3 + $0x80] sm:$0xff] }
  0x24   : > { %v2150_v53 = vpop.eup %2149  ;;  %2159 = vrcp.f32 %v263_v50  ;;  %v265_v54 = vadd.f32 1.0, %v2148_v51  ;;  %v1502_v50 = vld [vmem:[%s2492_s3 + $0x88] sm:$0xff] }
  0x25   : > { %v2152_v55 = vpop.eup %2151  ;;  %2161 = vrcp.f32 %v264_v52  ;;  %v266_v56 = vadd.f32 1.0, %v2150_v53  ;;  %v2064_v53 = vpack.c.bf16 %v1502_v50, %v1501_v49 }
  0x26   : > { %v2154_v57 = vpop.eup %2153  ;;  %2163 = vrcp.f32 %v265_v54  ;;  %v267_v58 = vadd.f32 1.0, %v2152_v55  ;;  %v610_v55 = vld [vmem:[#allocation2 + $0x2] sm:$0xff] }
  0x27   : > { %v2156_v59 = vpop.eup %2155  ;;  %2165 = vrcp.f32 %v266_v56  ;;  %v268_v60 = vadd.f32 1.0, %v2154_v57  ;;  %v1206_v57 = vld [vmem:[#allocation2 + $0x90] sm:$0xff] }
  0x28   : > { %v2158_v61 = vpop.eup %2157  ;;  %2167 = vrcp.f32 %v267_v58  ;;  %v269_v62 = vadd.f32 1.0, %v2156_v59  ;;  %v1353_v59 = vld [vmem:[#allocation2 + $0x91] sm:$0xff] }
  0x29   : > { %2169 = vrcp.f32 %v268_v60  ;;  %v270_v63 = vadd.f32 1.0, %v2158_v61 }
  0x2a   : > { %2171 = vrcp.f32 %v269_v62 }
  0x2b   : > { %2173 = vrcp.f32 %v270_v63 }
  0x2e   : > { %v2160_v0 = vpop.eup %2159 }
  0x2f   : > { %v2162_v1 = vpop.eup %2161  ;;  %v287_v2 = vmul.f32 %v2160_v0, %v231_v28 }
  0x30   : > { %v2164_v3 = vpop.eup %2163  ;;  %v288_v4 = vmul.f32 %v2162_v1, %v232_v29 }
  0x31   : > { %v2166_v5 = vpop.eup %2165  ;;  %324 = vst.msk [vmem:[#allocation2 + $0x11] sm:$0xff] %vm295_vm0, %v287_v2  ;;  %v289_v6 = vmul.f32 %v2164_v3, %v233_v33 }
  0x32   : > { %v2168_v8 = vpop.eup %2167  ;;  %325 = vst.msk [vmem:[#allocation2 + $0x21] sm:$0xff] %vm295_vm0, %v288_v4  ;;  %v290_v9 = vmul.f32 %v2166_v5, %v234_v34 }
  0x33   : > { %v2170_v11 = vpop.eup %2169  ;;  %326 = vst.msk [vmem:[#allocation2 + $0x31] sm:$0xff] %vm295_vm0, %v289_v6  ;;  %v291_v13 = vmul.f32 %v2168_v8, %v235_v35 }
  0x34   : > { %v2172_v14 = vpop.eup %2171  ;;  %327 = vst.msk [vmem:[#allocation2 + $0x41] sm:$0xff] %vm295_vm0, %v290_v9  ;;  %v292_v15 = vmul.f32 %v2170_v11, %v236_v39  ;;  %v765_v39 = vld [vmem:[%s2492_s3 + $0x30] sm:$0xff] }
  0x35   : > { %v2174_v16 = vpop.eup %2173  ;;  %328 = vst.msk [vmem:[#allocation2 + $0x51] sm:$0xff] %vm295_vm0, %v291_v13  ;;  %v293_v19 = vmul.f32 %v2172_v14, %v237_v40  ;;  %v766_v40 = vld [vmem:[%s2492_s3 + $0x38] sm:$0xff] }
  0x36   : > { %329 = vst.msk [vmem:[#allocation2 + $0x61] sm:$0xff] %vm295_vm0, %v292_v15  ;;  %v294_v22 = vmul.f32 %v2174_v16, %v238_v43  ;;  %v2044_v45 = vpack.c.bf16 %v766_v40, %v765_v39 }
  0x37   : > { %330 = vst.msk [vmem:[#allocation2 + $0x71] sm:$0xff] %vm295_vm0, %v293_v19 }
  0x38   : > { %v343_v23 = vld [vmem:[#allocation2 + $0x11] sm:$0xff]  ;;  %331 = vst.msk [vmem:[#allocation2 + $0x81] sm:$0xff] %vm295_vm0, %v294_v22 }
  0x39   : > { %1893 = vmatmul.mubr.msk.f32.vlgmr.msra.gmra.mrb[0].mxu1 %vm295_vm0, %v343_v23  ;;  %1956 = vmatprep.mubr.msk.f32.mxu0 %vm295_vm0, %v343_v23  ;;  %v2314_v25 = vld [vmem:[#allocation2 + $0x21] sm:$0xff]  ;;  %v2328_v29 = vld [vmem:[#allocation2 + $0x12] sm:$0xff] }
  0x3a   : > { %2039 = vmatpush3.bf16.msra.mxu1 %v2265_v10  ;;  %1957 = vmatmul.mubr.msk.f32.vlgmr.msra.gmra.mrb[0].mxu0 %vm295_vm0, %v2314_v25  ;;  %v2319_v27 = vld [vmem:[#allocation2 + $0x31] sm:$0xff]  ;;  %v2346_v31 = vld [vmem:[#allocation2 + $0x22] sm:$0xff] }
  0x3b   : > { %2055 = vmatpush3.bf16.msra.mxu0 %v2274_v12  ;;  %1895 = vmatprep.mubr.msk.f32.mxu1 %vm295_vm0, %v2314_v25  ;;  %v2324_v28 = vld [vmem:[#allocation2 + $0x41] sm:$0xff]  ;;  %v1354_v10 = vld [vmem:[%s2492_s3 + $0x70] sm:$0xff]  ;;  %v1355_v12 = vld [vmem:[%s2492_s3 + $0x78] sm:$0xff] }
  0x3c   : > { %1959 = vmatprep.mubr.msk.f32.mxu0 %vm295_vm0, %v2319_v27  ;;  %2057 = vmatprep.subr.bf16.mxu0 %v2056_v24  ;;  %v2342_v30 = vld [vmem:[#allocation2 + $0x51] sm:$0xff]  ;;  %v2060_v34 = vpack.c.bf16 %v1355_v12, %v1354_v10  ;;  %v2362_v36 = vld [vmem:[#allocation2 + $0x42] sm:$0xff] }
  0x3d   : > { %1896 = vmatmul.mubr.msk.f32.gmra.mrb[2].mxu1 %vm295_vm0, %v2319_v27  ;;  %2041 = vmatprep.subr.bf16.mxu1 %v2040_v26  ;;  %v2348_v32 = vld [vmem:[#allocation2 + $0x61] sm:$0xff]  ;;  %v2350_v33 = vld [vmem:[#allocation2 + $0x32] sm:$0xff] }
  0x3e   : > { %1960 = vmatmul.mubr.msk.f32.gmra.mrb[2].mxu0 %vm295_vm0, %v2324_v28  ;;  %1898 = vmatprep.mubr.msk.f32.mxu1 %vm295_vm0, %v2324_v28  ;;  %v2358_v35 = vld [vmem:[#allocation2 + $0x71] sm:$0xff]  ;;  %v2379_v42 = vld [vmem:[#allocation2 + $0x62] sm:$0xff] }
  0x3f   : > { %1972 = vmatprep.mubr.msk.f32.mxu0 %vm295_vm0, %v2328_v29  ;;  %v2364_v38 = vld [vmem:[#allocation2 + $0x52] sm:$0xff]  ;;  %v334_v43 = vld [vmem:[#allocation2 + $0x20] sm:$0xff] }
  0x40   : > { %v333_v41 = vld [vmem:[#allocation2 + $0x10] sm:$0xff]  ;;  %v2389_v47 = vld [vmem:[#allocation2 + $0x82] sm:$0xff] }
  0x41   : > { %1899 = vmatmul.mubr.msk.f32.gmra.mrb[4].mxu1 %vm295_vm0, %v2342_v30  ;;  %v2381_v44 = vld [vmem:[#allocation2 + $0x72] sm:$0xff]  ;;  %v336_v48 = vld [vmem:[#allocation2 + $0x40] sm:$0xff] }
  0x42   : > { %1973 = vmatmul.mubr.msk.f32.vlgmr.msra.gmra.mrb[0].mxu0 %vm295_vm0, %v2346_v31  ;;  %1901 = vmatprep.mubr.msk.f32.mxu1 %vm295_vm0, %v2348_v32  ;;  %v335_v46 = vld [vmem:[#allocation2 + $0x30] sm:$0xff]  ;;  %v338_v52 = vld [vmem:[#allocation2 + $0x60] sm:$0xff] }
  0x43   : > { %2059 = vmatpush3.bf16.msra.mxu0 %v2056_v24  ;;  %1975 = vmatprep.mubr.msk.f32.mxu0 %vm295_vm0, %v2350_v33  ;;  %v337_v51 = vld [vmem:[#allocation2 + $0x50] sm:$0xff]  ;;  %v1205_v56 = vld [vmem:[#allocation2 + $0x80] sm:$0xff] }
  0x44   : > { %2061 = vmatprep.subr.bf16.mxu0 %v2060_v34  ;;  %v339_v54 = vld [vmem:[#allocation2 + $0x70] sm:$0xff]  ;;  %v1352_v58 = vld [vmem:[#allocation2 + $0x81] sm:$0xff] }
  0x45   : > { %1902 = vmatmul.mubr.msk.f32.gmra.mrb[6].mxu1 %vm295_vm0, %v2358_v35 }
  0x46   : > { %1976 = vmatmul.mubr.msk.f32.gmra.mrb[2].mxu0 %vm295_vm0, %v2362_v36  ;;  %1908 = vmatprep.mubr.msk.f32.mxu1 %vm295_vm0, %v332_v37 }
  0x47   : > { %1978 = vmatprep.mubr.msk.f32.mxu0 %vm295_vm0, %v2364_v38 }
  0x49   : > { %1909 = vmatmul.mubr.msk.f32.vlgmr.msra.gmra.mrb[0].mxu1 %vm295_vm0, %v333_v41 }
  0x4a   : > { %2043 = vmatpush3.bf16.msra.mxu1 %v2040_v26  ;;  %1979 = vmatmul.mubr.msk.f32.gmra.mrb[4].mxu0 %vm295_vm0, %v2379_v42 }
  0x4b   : > { %1911 = vmatprep.mubr.msk.f32.mxu1 %vm295_vm0, %v334_v43  ;;  %1981 = vmatprep.mubr.msk.f32.mxu0 %vm295_vm0, %v2381_v44 }
  0x4c   : > { %2045 = vmatprep.subr.bf16.mxu1 %v2044_v45 }
  0x4d   : > { %1912 = vmatmul.mubr.msk.f32.gmra.mrb[2].mxu1 %vm295_vm0, %v335_v46 }
  0x4e   : > { %1982 = vmatmul.mubr.msk.f32.gmra.mrb[6].mxu0 %vm295_vm0, %v2389_v47  ;;  %1914 = vmatprep.mubr.msk.f32.mxu1 %vm295_vm0, %v336_v48 }
  0x4f   : > { %1988 = vmatprep.mubr.msk.f32.mxu0 %vm295_vm0, %v334_v43 }
  0x51   : > { %1915 = vmatmul.mubr.msk.f32.gmra.mrb[4].mxu1 %vm295_vm0, %v337_v51 }
  0x52   : > { %1989 = vmatmul.mubr.msk.f32.vlgmr.msra.gmra.mrb[0].mxu0 %vm295_vm0, %v335_v46  ;;  %1917 = vmatprep.mubr.msk.f32.mxu1 %vm295_vm0, %v338_v52 }
  0x53   : > { %2063 = vmatpush3.bf16.msra.mxu0 %v2060_v34  ;;  %1991 = vmatprep.mubr.msk.f32.mxu0 %vm295_vm0, %v336_v48 }
  0x54   : > { %2065 = vmatprep.subr.bf16.mxu0 %v2064_v53 }
  0x55   : > { %1918 = vmatmul.mubr.msk.f32.gmra.mrb[6].mxu1 %vm295_vm0, %v339_v54 }
  0x56   : > { %1992 = vmatmul.mubr.msk.f32.gmra.mrb[2].mxu0 %vm295_vm0, %v337_v51  ;;  %1924 = vmatprep.mubr.msk.f32.mxu1 %vm295_vm0, %v610_v55 }
  0x57   : > { %1994 = vmatprep.mubr.msk.f32.mxu0 %vm295_vm0, %v338_v52 }
  0x59   : > { %1925 = vmatmul.mubr.msk.f32.vlgmr.msra.gmra.mrb[0].mxu1 %vm295_vm0, %v2328_v29 }
  0x5a   : > { %2047 = vmatpush3.bf16.msra.mxu1 %v2044_v45  ;;  %1995 = vmatmul.mubr.msk.f32.gmra.mrb[4].mxu0 %vm295_vm0, %v339_v54 }
  0x5b   : > { %1927 = vmatprep.mubr.msk.f32.mxu1 %vm295_vm0, %v2346_v31  ;;  %1997 = vmatprep.mubr.msk.f32.mxu0 %vm295_vm0, %v1205_v56 }
  0x5c   : > { %2068 = vmatprep.subr.bf16.mxu1 %v2236_v7 }
  0x5d   : > { %1928 = vmatmul.mubr.msk.f32.gmra.mrb[2].mxu1 %vm295_vm0, %v2350_v33 }
  0x5e   : > { %1998 = vmatmul.mubr.msk.f32.gmra.mrb[6].mxu0 %vm295_vm0, %v1206_v57  ;;  %1930 = vmatprep.mubr.msk.f32.mxu1 %vm295_vm0, %v2362_v36 }
  0x5f   : > { %2004 = vmatprep.mubr.msk.f32.mxu0 %vm295_vm0, %v2314_v25 }
  0x61   : > { %1931 = vmatmul.mubr.msk.f32.gmra.mrb[4].mxu1 %vm295_vm0, %v2364_v38 }
  0x62   : > { %2005 = vmatmul.mubr.msk.f32.vlgmr.msra.gmra.mrb[0].mxu0 %vm295_vm0, %v2319_v27  ;;  %1933 = vmatprep.mubr.msk.f32.mxu1 %vm295_vm0, %v2379_v42 }
  0x63   : > { %2067 = vmatpush3.bf16.msra.mxu0 %v2064_v53  ;;  %2007 = vmatprep.mubr.msk.f32.mxu0 %vm295_vm0, %v2324_v28 }
  0x65   : > { %1934 = vmatmul.mubr.msk.f32.gmra.mrb[6].mxu1 %vm295_vm0, %v2381_v44 }
  0x66   : > { %2008 = vmatmul.mubr.msk.f32.gmra.mrb[2].mxu0 %vm295_vm0, %v2342_v30  ;;  %1940 = vmatprep.mubr.msk.f32.mxu1 %vm295_vm0, %v333_v41 }
  0x67   : > { %2010 = vmatprep.mubr.msk.f32.mxu0 %vm295_vm0, %v2348_v32 }
  0x69   : > { %1941 = vmatmul.mubr.msk.f32.vlgmr.msra.gmra.mrb[0].mxu1 %vm295_vm0, %v334_v43 }
  0x6a   : > { %2069 = vmatpush3.bf16.msra.mxu1 %v2236_v7  ;;  %2011 = vmatmul.mubr.msk.f32.gmra.mrb[4].mxu0 %vm295_vm0, %v2358_v35  ;;  %v1500_v7 = vld [vmem:[#allocation2 + $0x92] sm:$0xff] }
  0x6b   : > { %1943 = vmatprep.mubr.msk.f32.mxu1 %vm295_vm0, %v335_v46  ;;  %2013 = vmatprep.mubr.msk.f32.mxu0 %vm295_vm0, %v1352_v58 }
  0x6d   : > { %1944 = vmatmul.mubr.msk.f32.gmra.mrb[2].mxu1 %vm295_vm0, %v336_v48 }
  0x6e   : > { %2014 = vmatmul.mubr.msk.f32.gmra.mrb[6].mxu0 %vm295_vm0, %v1353_v59  ;;  %1946 = vmatprep.mubr.msk.f32.mxu1 %vm295_vm0, %v337_v51 }
  0x6f   : > { %2020 = vmatprep.mubr.msk.f32.mxu0 %vm295_vm0, %v2346_v31 }
  0x71   : > { %1947 = vmatmul.mubr.msk.f32.gmra.mrb[4].mxu1 %vm295_vm0, %v338_v52 }
  0x72   : > { %2021 = vmatmul.mubr.msk.f32.vlgmr.msra.gmra.mrb[0].mxu0 %vm295_vm0, %v2350_v33  ;;  %1949 = vmatprep.mubr.msk.f32.mxu1 %vm295_vm0, %v339_v54 }
  0x73   : > { %2023 = vmatprep.mubr.msk.f32.mxu0 %vm295_vm0, %v2362_v36 }
  0x75   : > { %1950 = vmatmul.mubr.msk.f32.gmra.mrb[6].mxu1 %vm295_vm0, %v1205_v56 }
  0x76   : > { %2024 = vmatmul.mubr.msk.f32.gmra.mrb[2].mxu0 %vm295_vm0, %v2364_v38  ;;  %1962 = vmatprep.mubr.msk.f32.mxu1 %vm295_vm0, %v2342_v30 }
  0x77   : > { %2026 = vmatprep.mubr.msk.f32.mxu0 %vm295_vm0, %v2379_v42 }
  0x79   : > { %1963 = vmatmul.mubr.msk.f32.vlgmr.msra.gmra.mrb[4].mxu1 %vm295_vm0, %v2348_v32 }
  0x7a   : > { %2027 = vmatmul.mubr.msk.f32.gmra.mrb[4].mxu0 %vm295_vm0, %v2381_v44  ;;  %1965 = vmatprep.mubr.msk.f32.mxu1 %vm295_vm0, %v2358_v35 }
  0x7b   : > { %2029 = vmatprep.mubr.msk.f32.mxu0 %vm295_vm0, %v2389_v47 }
  0x7d   : > { %1966 = vmatmul.mubr.msk.f32.gmra.mrb[6].mxu1 %vm295_vm0, %v1352_v58 }
  0x7e   : > { %2030 = vmatmul.mubr.msk.f32.gmra.mrb[6].mxu0 %vm295_vm0, %v1500_v7 }
 0x13c   : > { %v1942_v60 = vpop.f32.mrb[0].mxu1 }
 0x13d   : > { %v857_v61 = vpop.f32.mrb[1].mxu1 }
 0x140   : > { %v1945_v62 = vpop.f32.mrb[2].mxu1 }
 0x141   : > { %v867_v63 = vpop.f32.mrb[3].mxu1 }
 0x145   : > { %v2022_v0 = vpop.f32.mrb[0].mxu0 }
 0x146   : > { %v2070_v1 = vadd.f32 %v2022_v0, %v1942_v60  ;;  %v1593_v2 = vpop.f32.mrb[1].mxu0 }
 0x147   : > { %v2071_v3 = vadd.f32 %v1593_v2, %v857_v61 }
 0x148   : > { %1642 = vst.msk [vmem:[%s199_s16 + $0x8] sm:$0xff] %vm1640_vm3, %v2070_v1 }
 0x149   : > { %1641 = vst.msk [vmem:[%s199_s16] sm:$0xff] %vm1640_vm3, %v2071_v3  ;;  %v2025_v4 = vpop.f32.mrb[2].mxu0 }
 0x14a   : > { %v2072_v5 = vadd.f32 %v2025_v4, %v1945_v62  ;;  %v1603_v6 = vpop.f32.mrb[3].mxu0 }
 0x14b   : > { %v2073_v8 = vadd.f32 %v1603_v6, %v867_v63 }
 0x14c   : > { %1644 = vst.msk [vmem:[%s199_s16 + $0x18] sm:$0xff] %vm1640_vm3, %v2072_v5  ;;  %v1964_v9 = vpop.f32.mrb[4].mxu1 }
 0x14d   : > { %1643 = vst.msk [vmem:[%s199_s16 + $0x10] sm:$0xff] %vm1640_vm3, %v2073_v8  ;;  %v1024_v11 = vpop.f32.mrb[5].mxu1  ;;  %v2028_v13 = vpop.f32.mrb[4].mxu0 }
 0x14e   : > { %v2074_v14 = vadd.f32 %v2028_v13, %v1964_v9  ;;  %v1613_v15 = vpop.f32.mrb[5].mxu0 }
 0x14f   : > { %v2075_v16 = vadd.f32 %v1613_v15, %v1024_v11 }
 0x150   : > { %1646 = vst.msk [vmem:[%s199_s16 + $0x28] sm:$0xff] %vm1640_vm3, %v2074_v14  ;;  %v1967_v17 = vpop.f32.mrb[6].mxu1 }
 0x151   : > { %1645 = vst.msk [vmem:[%s199_s16 + $0x20] sm:$0xff] %vm1640_vm3, %v2075_v16  ;;  %v1034_v18 = vpop.f32.mrb[7].mxu1  ;;  %v2031_v19 = vpop.f32.mrb[6].mxu0 }
 0x152   : > { %v2076_v20 = vadd.f32 %v2031_v19, %v1967_v17  ;;  %v1623_v21 = vpop.f32.mrb[7].mxu0 }
 0x153   : > { %v2077_v22 = vadd.f32 %v1623_v21, %v1034_v18 }
 0x154   : > { %1648 = vst.msk [vmem:[%s199_s16 + $0x38] sm:$0xff] %vm1640_vm3, %v2076_v20 }
 0x155   : > { %1647 = vst.msk [vmem:[%s199_s16 + $0x30] sm:$0xff] %vm1640_vm3, %v2077_v22 }
 0x156 PF: > { %s14_s15 = sadd.s32 1, %s2181_s15  }
 0x157   : > { %p11_p4 = scmp.ge.s32.totalorder %s14_s15, 4  }
 0x159   :  { %13 = sbr.rel (!%p11_p4) target bundleno = 1 (0x1), region = 69 }

// kernel: encoder_conv_se_block.7
= control target key start
LH: loop header
LB: loop body
LE: loop exit
PB: predicated region body
PF: predicated region fallthrough
CT: control target
= control target key end

     0   :  { %12 = vsyncpa [#allocation4], 0  ;;  %s3280_s0 = inlined_call_operand.vmem [shape: f32[128,32], index: 0, kind: input, shape index: {}]   ;;  %s3281_s1 = inlined_call_operand.vmem [shape: f32[1,32], index: 1, kind: input, shape index: {}]   ;;  %s3282_s2 = inlined_call_operand.vmem [shape: f32[1,32], index: 2, kind: input, shape index: {}]   ;;  %s3283_s3 = inlined_call_operand.vmem [shape: f32[288,32], index: 3, kind: input, shape index: {}]   ;;  %s3284_s4 = inlined_call_operand.vmem [shape: f32[1,32], index: 4, kind: input, shape index: {}]   ;;  %s3285_s5 = inlined_call_operand.vmem [shape: f32[32,4], index: 5, kind: input, shape index: {}]   ;;  %s3286_s6 = inlined_call_operand.vmem [shape: f32[4,32], index: 6, kind: input, shape index: {}]   ;;  %s3287_s7 = inlined_call_operand.hbm [shape: f32[128,32], index: 7, kind: output, shape index: {}]  }
   0x1   :  { %14 = vsyncpa [#allocation4 + $0x1], 0  ;;  %s2777_s24 = smov 0   ;;  %s2779_s25 = smov 0  }
   0x2   :  { %s2781_s26 = smov 0   ;;  %s2783_s27 = smov 0  }
   0x3 LB: > { %s2798_s28 = sadd.s32 4294967295, %s2729_s27   ;;  %s2034_s29 = sadd.s32 4294967294, %s2729_s27   ;;  %s2729_s27 = sphi %s2783_s27, %s3293_s27   ;;  %s2725_s26 = sphi %s2781_s26, %s3292_s26   ;;  %s2721_s25 = sphi %s2779_s25, %s3291_s25   ;;  %s2717_s24 = sphi %s2777_s24, %s3290_s24  }
   0x4   : > { %s2802_s30 = sadd.s32 1, %s2729_s27   ;;  %s179_s8 = sadd.s32 1, %s2725_s26 }
   0x5   : > { %s176_s9 = ssub.s32 %s2729_s27, %s2802_s30  ;;  %p189_p0 = scmp.ne.s32.totalorder %s2725_s26, %s2721_s25 }
   0x6   : > { %p177_p1 = scmp.eq.s32.totalorder %s176_s9, 0  ;;  %p190_p2 = scmp.eq.s32.totalorder %s2798_s28, 1 }
   0x7   : > { %p195_p3 = scmp.ne.s32.totalorder %s2721_s25, %s2717_s24  ;;  %p196_p4 = scmp.eq.s32.totalorder %s2034_s29, 1 }
   0x8   : > { %s2813_s10 = scalar_select %p177_p1, %s2725_s26, %s179_s8  }
   0x9   : > { %p2815_p5 = por %p190_p2, %p189_p0  ;;  %p2819_p6 = por %p196_p4, %p195_p3 }
   0xa   : > { %p2037_p7 = scmp.ge.s32.totalorder %s2729_s27, 1  ;;  %p241_p8 = scmp.lt.s32.totalorder %s2729_s27, 3 }
   0xc   : > { %p242_p9 = pnand %p2037_p7, %p241_p8 }
   0xd   : > { %v431_v0 = vld [vmem:[%s3283_s3 + $0x20] sm:$0xff] (!%p242_p9)  ;;  %v432_v1 = vld [vmem:[%s3283_s3 + $0x28] sm:$0xff] (!%p242_p9)  ;;  %vm374_vm0 = vcmask (!%p242_p9), 261120   ;;  %vm376_vm1 = vcmask (!%p242_p9), 254976   ;;  %v433_v5 = vld [vmem:[%s3283_s3 + $0x30] sm:$0xff] (!%p242_p9)  ;;  %v2731_v7 = vmov (!%p242_p9), 0.0  }
   0xe   : > { %245 = sbr.rel (%p242_p9) target bundleno = 852 (0x354), region = 48  ;;  %v999_v2 = vld [vmem:[%s3283_s3 + $0x80] sm:$0xff] (!%p242_p9)  ;;  %v2445_v3 = vpack.c.bf16 (!%p242_p9), %v432_v1, %v431_v0  ;;  %v1000_v4 = vld [vmem:[%s3283_s3 + $0x88] sm:$0xff] (!%p242_p9)  ;;  %v434_v6 = vld [vmem:[%s3283_s3 + $0x38] sm:$0xff] (!%p242_p9)  ;;  %375 = vst.msk [vmem:[#allocation2] sm:$0xff] (!%p242_p9), %vm374_vm0, %v2731_v7  ;;  %vm381_vm2 = vcmask (!%p242_p9), 253952  }
   0xf   : > { %377 = vst.msk [vmem:[#allocation2 + $0x8] sm:$0x3] (!%p242_p9), %vm376_vm1, %v2731_v7  ;;  %380 = vst.msk [vmem:[#allocation2 + $0x98] sm:$0x3] (!%p242_p9), %vm376_vm1, %v2731_v7  ;;  %s2039_s8 = sshll.u32 (!%p242_p9), %s2798_s28, 3  ;;  %v2477_v8 = vpack.c.bf16 (!%p242_p9), %v1000_v4, %v999_v2  ;;  %v2449_v9 = vpack.c.bf16 (!%p242_p9), %v434_v6, %v433_v5  ;;  %v1001_v10 = vld [vmem:[%s3283_s3 + $0x90] sm:$0xff] (!%p242_p9) }
  0x10   : > { %379 = vst.msk [vmem:[#allocation2 + $0x90] sm:$0xff] (!%p242_p9), %vm374_vm0, %v2731_v7  ;;  %v1002_v11 = vld [vmem:[%s3283_s3 + $0x98] sm:$0xff] (!%p242_p9)  ;;  %p274_p10 = scmp.lt.s32.totalorder (!%p242_p9), %s2039_s8, 15  ;;  %2446 = vmatprep.subr.bf16.mxu1 (!%p242_p9), %v2445_v3  ;;  %v1148_v13 = vld [vmem:[%s3283_s3 + $0xa0] sm:$0xff] (!%p242_p9)  ;;  %v1149_v14 = vld [vmem:[%s3283_s3 + $0xa8] sm:$0xff] (!%p242_p9)  ;;  %vm2733_vm3 = vmmov (!%p242_p9), 0  }
  0x11   : > { %392 = vst.msk [vmem:[#allocation2 + $0x9] sm:$0x1] (!%p242_p9), %vm381_vm2, %v2731_v7  ;;  %382 = vst.msk [vmem:[#allocation2] sm:$0x1] (!%p242_p9), %vm381_vm2, %v2731_v7  ;;  %v2481_v12 = vpack.c.bf16 (!%p242_p9), %v1002_v11, %v1001_v10  ;;  %2478 = vmatprep.subr.bf16.mxu0 (!%p242_p9), %v2477_v8  ;;  %2448 = vmatpush3.bf16.msra.mxu1 (!%p242_p9), %v2445_v3  ;;  %v419_v15 = vld [vmem:[%s3283_s3] sm:$0xff] (!%p242_p9)  ;;  %v420_v16 = vld [vmem:[%s3283_s3 + $0x8] sm:$0xff] (!%p242_p9)  ;;  %v2915_v18 = vpack.c.bf16 (!%p242_p9), %v1149_v14, %v1148_v13 }
  0x12   : > { %383 = vst.msk [vmem:[#allocation2 + $0x10] sm:$0x1] (!%p242_p9), %vm381_vm2, %v2731_v7  ;;  %384 = vst.msk [vmem:[#allocation2 + $0x20] sm:$0x1] (!%p242_p9), %vm381_vm2, %v2731_v7  ;;  %2480 = vmatpush3.bf16.msra.mxu0 (!%p242_p9), %v2477_v8  ;;  %2450 = vmatprep.subr.bf16.mxu1 (!%p242_p9), %v2449_v9  ;;  %v2041_v17 = vld [vmem:[%s3281_s1] ss:$0 sm:$0xff] (!%p242_p9)  ;;  %v2917_v19 = vpack.c.bf16 (!%p242_p9), %v420_v16, %v419_v15 }
  0x13   : > { %385 = vst.msk [vmem:[#allocation2 + $0x30] sm:$0x1] (!%p242_p9), %vm381_vm2, %v2731_v7  ;;  %386 = vst.msk [vmem:[#allocation2 + $0x40] sm:$0x1] (!%p242_p9), %vm381_vm2, %v2731_v7  ;;  %2482 = vmatprep.subr.bf16.mxu0 (!%p242_p9), %v2481_v12  ;;  %v2042_v20 = vld [vmem:[%s3282_s2] ss:$0 sm:$0xff] (!%p242_p9) }
  0x14   : > { %387 = vst.msk [vmem:[#allocation2 + $0x50] sm:$0x1] (!%p242_p9), %vm381_vm2, %v2731_v7  ;;  %388 = vst.msk [vmem:[#allocation2 + $0x60] sm:$0x1] (!%p242_p9), %vm381_vm2, %v2731_v7  ;;  %vm1858_vm4 = vcmask (!%p242_p9), 1043456   ;;  %vm1854_vm5 = vcmask (!%p242_p9), 31744  }
  0x15   : > { %389 = vst.msk [vmem:[#allocation2 + $0x70] sm:$0x1] %vm381_vm2, %v2731_v7  ;;  %390 = vst.msk [vmem:[#allocation2 + $0x80] sm:$0x1] %vm381_vm2, %v2731_v7  ;;  %s3295_s8 = smov (!%p274_p10, %s2039_s8), 15  ;;  %2452 = vmatpush3.bf16.msra.mxu1 %v2449_v9  ;;  %s270_s22 = sand.u32 1, %s2721_s25  }
  0x16   : > { %393 = vst.msk [vmem:[#allocation2 + $0x19] sm:$0x1] %vm381_vm2, %v2731_v7  ;;  %394 = vst.msk [vmem:[#allocation2 + $0x29] sm:$0x1] %vm381_vm2, %v2731_v7  ;;  %s2040_s29 = sshll.u32 %s3295_s8, 3  ;;  %v423_v21 = vld [vmem:[#allocation2 + $0x1] sm:$0xff]  ;;  %2484 = vmatpush3.bf16.msra.mxu0 %v2481_v12  ;;  %2454 = vmatprep.subr.bf16.mxu1 %v2917_v19 }
  0x17   : > { %395 = vst.msk [vmem:[#allocation2 + $0x39] sm:$0x1] %vm381_vm2, %v2731_v7  ;;  %396 = vst.msk [vmem:[#allocation2 + $0x49] sm:$0x1] %vm381_vm2, %v2731_v7  ;;  %s277_s16 = scalar_lea.vmem %s3280_s0, %s2040_s29  ;;  %2257 = vmatprep.mubr.msk.f32.mxu1 %vm374_vm0, %v423_v21  ;;  %2486 = vmatprep.subr.bf16.mxu0 %v2915_v18  ;;  %s2038_s23 = sshll.u32 %s270_s22, 6 }
  0x18   : > { %397 = vst.msk [vmem:[#allocation2 + $0x59] sm:$0x1] %vm381_vm2, %v2731_v7  ;;  %398 = vst.msk [vmem:[#allocation2 + $0x69] sm:$0x1] %vm381_vm2, %v2731_v7  ;;  %v280_v22 = vld [vmem:[%s277_s16] sm:$0xff]  ;;  %v281_v23 = vld [vmem:[%s277_s16 + $0x8] sm:$0xff] }
  0x19   : > { %399 = vst.msk [vmem:[#allocation2 + $0x79] sm:$0x1] %vm381_vm2, %v2731_v7  ;;  %400 = vst.msk [vmem:[#allocation2 + $0x89] sm:$0x1] %vm381_vm2, %v2731_v7  ;;  %v295_v24 = vmul.f32 %v2041_v17, %v280_v22  ;;  %v296_v25 = vmul.f32 %v2041_v17, %v281_v23  ;;  %v282_v26 = vld [vmem:[%s277_s16 + $0x10] sm:$0xff]  ;;  %v283_v27 = vld [vmem:[%s277_s16 + $0x18] sm:$0xff] }
  0x1a   : > { %401 = vst.msk [vmem:[#allocation2 + $0x99] sm:$0x1] %vm381_vm2, %v2731_v7  ;;  %391 = vst.msk [vmem:[#allocation2 + $0x90] sm:$0x1] %vm381_vm2, %v2731_v7  ;;  %v284_v28 = vld [vmem:[%s277_s16 + $0x20] sm:$0xff]  ;;  %v297_v29 = vmul.f32 %v2041_v17, %v282_v26  ;;  %v298_v30 = vmul.f32 %v2041_v17, %v283_v27  ;;  %v285_v32 = vld [vmem:[%s277_s16 + $0x28] sm:$0xff] }
  0x1b   : > { %v299_v31 = vmul.f32 %v2041_v17, %v284_v28  ;;  %v286_v33 = vld [vmem:[%s277_s16 + $0x30] sm:$0xff]  ;;  %v287_v34 = vld [vmem:[%s277_s16 + $0x38] sm:$0xff]  ;;  %v310_v35 = vadd.f32 %v2042_v20, %v295_v24  ;;  %v311_v36 = vadd.f32 %v2042_v20, %v296_v25  ;;  %v300_v37 = vmul.f32 %v2041_v17, %v285_v32  ;;  %s2133_s29 = sshll.u32 %s2798_s28, 10  ;;  %s272_s9 = scalar_lea.vmem [#allocation3], %s2038_s23 }
  0x1c   : > { %v301_v38 = vmul.f32 %v2041_v17, %v286_v33  ;;  %v312_v39 = vadd.f32 %v2042_v20, %v297_v29  ;;  %v313_v40 = vadd.f32 %v2042_v20, %v298_v30  ;;  %v302_v42 = vmul.f32 %v2041_v17, %v287_v34  ;;  %v1150_v23 = vld [vmem:[%s3283_s3 + $0xb0] sm:$0xff]  ;;  %v1151_v24 = vld [vmem:[%s3283_s3 + $0xb8] sm:$0xff]  ;;  %v1298_v33 = vld [vmem:[%s3283_s3 + $0xc0] sm:$0xff]  ;;  %s1972_s13 = sshll.u32 %s272_s9, 4  ;;  %s3227_s16 = scalar_lea.hbm %s3287_s7, %s2133_s29  ;;  %s3229_s13 = int_to_ptr.vmem [resolvable:$true] %s1972_s13 }
  0x1d   : > { %v314_v41 = vadd.f32 %v2042_v20, %v299_v31  ;;  %v2043_v43 = vmul.f32 -1.442695, %v310_v35  ;;  %v2044_v44 = vmul.f32 -1.442695, %v311_v36  ;;  %v315_v45 = vadd.f32 %v2042_v20, %v300_v37  ;;  %v421_v26 = vld [vmem:[%s3283_s3 + $0x10] sm:$0xff]  ;;  %v422_v27 = vld [vmem:[%s3283_s3 + $0x18] sm:$0xff] }
  0x1e   : > { %v316_v46 = vadd.f32 %v2042_v20, %v301_v38  ;;  %v2045_v47 = vmul.f32 -1.442695, %v312_v39  ;;  %v2046_v48 = vmul.f32 -1.442695, %v313_v40  ;;  %v317_v49 = vadd.f32 %v2042_v20, %v302_v42  ;;  %v1299_v34 = vld [vmem:[%s3283_s3 + $0xc8] sm:$0xff]  ;;  %s3239_s28 = scalar_lea.sflag [#allocation4], %s270_s22 }
  0x1f   : > { %2631 = vpow2.f32 %v2043_v43  ;;  %v2047_v50 = vmul.f32 -1.442695, %v314_v41  ;;  %v2048_v51 = vmul.f32 -1.442695, %v315_v45  ;;  %v2489_v30 = vpack.c.bf16 %v1151_v24, %v1150_v23  ;;  %v702_v37 = vld [vmem:[%s3283_s3 + $0x48] sm:$0xff]  ;;  %v411_v43 = vld [vmem:[#allocation2] sm:$0xff] }
  0x20   : > { %2633 = vpow2.f32 %v2044_v44  ;;  %v2049_v52 = vmul.f32 -1.442695, %v316_v46  ;;  %v2050_v53 = vmul.f32 -1.442695, %v317_v49  ;;  %v2457_v32 = vpack.c.bf16 %v422_v27, %v421_v26  ;;  %v1599_v23 = vld [vmem:[%s3283_s3 + $0x118] sm:$0xff]  ;;  %v1775_v27 = vld [vmem:[%s3285_s5] sm:$0xff] }
  0x21   : > { %2635 = vpow2.f32 %v2045_v47  ;;  %v1595_v26 = vld [vmem:[#allocation2 + $0x92] sm:$0xff]  ;;  %s2667_s17 = scalar_lea.vmem %s3229_s13, 1024  ;;  %s2734_s18 = smov [#allocation3]  }
  0x22   : > { %2637 = vpow2.f32 %v2046_v48  ;;  %v703_v48 = vld [vmem:[%s3283_s3 + $0x50] sm:$0xff]  ;;  %p2668_p11 = scmp.ne.s32.totalorder %s3229_s13, %s2667_s17  ;;  %s2671_s8 = sshll.u32 %s2734_s18, 4  ;;  %s2672_s8 = int_to_ptr.vmem [resolvable:$false] %s2671_s8 }
  0x23   : > { %2639 = vpow2.f32 %v2047_v50  ;;  %s2673_s19 = scalar_lea.vmem %s2672_s8, 2048  ;;  %p2674_p0 = scmp.lt.s32.totalorder %s3229_s13, %s2672_s8 }
  0x24   : > { %2641 = vpow2.f32 %v2048_v51  ;;  %p2669_p12 = pnand %p2668_p11, %p2815_p5  ;;  %p2675_p1 = scmp.lt.s32.totalorder %s2673_s19, %s2667_s17 }
  0x25   : > { %2643 = vpow2.f32 %v2049_v52 }
  0x26   : > { %2645 = vpow2.f32 %v2050_v53  ;;  %p2670_p13 = pneg %p2669_p12  ;;  %p2676_p2 = por %p2675_p1, %p2674_p0 }
  0x28   : > { %p2677_p3 = pnand %p2676_p2, %p2670_p13 }
  0x29   : > { %v2632_v54 = vpop.eup %2631 }
  0x2a   : > { %v2634_v55 = vpop.eup %2633  ;;  %v342_v56 = vadd.f32 1.0, %v2632_v54 }
  0x2b   : > { %v2636_v57 = vpop.eup %2635  ;;  %v343_v58 = vadd.f32 1.0, %v2634_v55  ;;  %v1447_v55 = vld [vmem:[%s3283_s3 + $0xe0] sm:$0xff] }
  0x2c   : > { %v2638_v59 = vpop.eup %2637  ;;  %2647 = vrcp.f32 %v342_v56  ;;  %v344_v60 = vadd.f32 1.0, %v2636_v57  ;;  %v1448_v56 = vld [vmem:[%s3283_s3 + $0xe8] sm:$0xff] }
  0x2d   : > { %v2640_v61 = vpop.eup %2639  ;;  %2649 = vrcp.f32 %v343_v58  ;;  %v345_v62 = vadd.f32 1.0, %v2638_v59  ;;  %v850_v58 = vld [vmem:[%s3283_s3 + $0x60] sm:$0xff]  ;;  %v851_v59 = vld [vmem:[%s3283_s3 + $0x68] sm:$0xff] }
  0x2e   : > { %v2642_v63 = vpop.eup %2641  ;;  %2651 = vrcp.f32 %v344_v60  ;;  %v346_v0 = vadd.f32 1.0, %v2640_v61 }
  0x2f   : > { %v2644_v1 = vpop.eup %2643  ;;  %2653 = vrcp.f32 %v345_v62  ;;  %v347_v2 = vadd.f32 1.0, %v2642_v63  ;;  %v2501_v63 = vpack.c.bf16 %v1448_v56, %v1447_v55 }
  0x30   : > { %v2646_v3 = vpop.eup %2645  ;;  %2655 = vrcp.f32 %v346_v0  ;;  %v348_v4 = vadd.f32 1.0, %v2644_v1  ;;  %v2469_v0 = vpack.c.bf16 %v851_v59, %v850_v58 }
  0x31   : > { %2657 = vrcp.f32 %v347_v2  ;;  %v349_v5 = vadd.f32 1.0, %v2646_v3 }
  0x32   : > { %2659 = vrcp.f32 %v348_v4 }
  0x33   : > { %2661 = vrcp.f32 %v349_v5 }
  0x36   : > { %v2648_v6 = vpop.eup %2647 }
  0x37   : > { %v2650_v8 = vpop.eup %2649  ;;  %v366_v9 = vmul.f32 %v2648_v6, %v310_v35 }
  0x38   : > { %v2652_v10 = vpop.eup %2651  ;;  %v367_v11 = vmul.f32 %v2650_v8, %v311_v36  ;;  %v701_v36 = vld [vmem:[%s3283_s3 + $0x40] sm:$0xff] }
  0x39   : > { %v2654_v12 = vpop.eup %2653  ;;  %403 = vst.msk [vmem:[#allocation2 + $0x11] sm:$0xff] %vm374_vm0, %v366_v9  ;;  %v368_v13 = vmul.f32 %v2652_v10, %v312_v39  ;;  %v693_v8 = vld [vmem:[#allocation2 + $0x2] sm:$0xff]  ;;  %v1449_v9 = vld [vmem:[%s3283_s3 + $0xf0] sm:$0xff]  ;;  %v1450_v10 = vld [vmem:[%s3283_s3 + $0xf8] sm:$0xff] }
  0x3a   : > { %v2656_v14 = vpop.eup %2655  ;;  %404 = vst.msk [vmem:[#allocation2 + $0x21] sm:$0xff] %vm374_vm0, %v367_v11  ;;  %v369_v15 = vmul.f32 %v2654_v12, %v313_v40  ;;  %v2493_v40 = vpack.c.bf16 %v1299_v34, %v1298_v33  ;;  %v852_v11 = vld [vmem:[%s3283_s3 + $0x70] sm:$0xff]  ;;  %v853_v12 = vld [vmem:[%s3283_s3 + $0x78] sm:$0xff] }
  0x3b   : > { %v2658_v16 = vpop.eup %2657  ;;  %405 = vst.msk [vmem:[#allocation2 + $0x31] sm:$0xff] %vm374_vm0, %v368_v13  ;;  %v370_v17 = vmul.f32 %v2656_v14, %v314_v41  ;;  %v2461_v41 = vpack.c.bf16 %v702_v37, %v701_v36  ;;  %v2505_v13 = vpack.c.bf16 %v1450_v10, %v1449_v9  ;;  %v2473_v14 = vpack.c.bf16 %v853_v12, %v852_v11 }
  0x3c   : > { %v2660_v20 = vpop.eup %2659  ;;  %406 = vst.msk [vmem:[#allocation2 + $0x41] sm:$0xff] %vm374_vm0, %v369_v15  ;;  %v371_v21 = vmul.f32 %v2658_v16, %v315_v45  ;;  %v1300_v45 = vld [vmem:[%s3283_s3 + $0xd0] sm:$0xff]  ;;  %v1596_v15 = vld [vmem:[%s3283_s3 + $0x100] sm:$0xff]  ;;  %v1597_v16 = vld [vmem:[%s3283_s3 + $0x108] sm:$0xff] }
  0x3d   : > { %v2662_v22 = vpop.eup %2661  ;;  %407 = vst.msk [vmem:[#allocation2 + $0x51] sm:$0xff] %vm374_vm0, %v370_v17  ;;  %v372_v25 = vmul.f32 %v2660_v20, %v316_v46  ;;  %v1301_v46 = vld [vmem:[%s3283_s3 + $0xd8] sm:$0xff]  ;;  %v2509_v17 = vpack.c.bf16 %v1597_v16, %v1596_v15 }
  0x3e   : > { %408 = vst.msk [vmem:[#allocation2 + $0x61] sm:$0xff] %vm374_vm0, %v371_v21  ;;  %v373_v28 = vmul.f32 %v2662_v22, %v317_v49  ;;  %v704_v49 = vld [vmem:[%s3283_s3 + $0x58] sm:$0xff]  ;;  %v2497_v53 = vpack.c.bf16 %v1301_v46, %v1300_v45  ;;  %v1297_v21 = vld [vmem:[#allocation2 + $0x90] sm:$0xff] }
  0x3f   : > { %409 = vst.msk [vmem:[#allocation2 + $0x71] sm:$0xff] %vm374_vm0, %v372_v25  ;;  %v2465_v54 = vpack.c.bf16 %v704_v49, %v703_v48  ;;  %v1598_v22 = vld [vmem:[%s3283_s3 + $0x110] sm:$0xff] }
  0x40   : > { %v424_v29 = vld [vmem:[#allocation2 + $0x11] sm:$0xff]  ;;  %410 = vst.msk [vmem:[#allocation2 + $0x81] sm:$0xff] %vm374_vm0, %v373_v28  ;;  %v2513_v24 = vpack.c.bf16 %v1599_v23, %v1598_v22  ;;  %v1776_v28 = vld [vmem:[%s3285_s5 + $0x8] sm:$0xff] }
  0x41   : > { %2258 = vmatmul.mubr.msk.f32.vlgmr.msra.gmra.mrb[0].mxu1 %vm374_vm0, %v424_v29  ;;  %2337 = vmatprep.mubr.msk.f32.mxu0 %vm374_vm0, %v424_v29  ;;  %v2950_v31 = vld [vmem:[#allocation2 + $0x21] sm:$0xff]  ;;  %v1140_v44 = vld [vmem:[#allocation2 + $0x12] sm:$0xff]  ;;  %v2518_v29 = vpack.c.bf16 %v1776_v28, %v1775_v27 }
  0x42   : > { %2338 = vmatmul.mubr.msk.f32.vlgmr.msra.gmra.mrb[0].mxu0 %vm374_vm0, %v2950_v31  ;;  %2260 = vmatprep.mubr.msk.f32.mxu1 %vm374_vm0, %v2950_v31  ;;  %v2962_v35 = vld [vmem:[#allocation2 + $0x31] sm:$0xff]  ;;  %v3020_v50 = vld [vmem:[#allocation2 + $0x22] sm:$0xff] }
  0x43   : > { %2488 = vmatpush3.bf16.msra.mxu0 %v2915_v18  ;;  %2340 = vmatprep.mubr.msk.f32.mxu0 %vm374_vm0, %v2962_v35  ;;  %v2973_v38 = vld [vmem:[#allocation2 + $0x41] sm:$0xff]  ;;  %v3011_v47 = vld [vmem:[#allocation2 + $0x10] sm:$0xff] }
  0x44   : > { %v2975_v39 = vld [vmem:[#allocation2 + $0x51] sm:$0xff]  ;;  %2490 = vmatprep.subr.bf16.mxu0 %v2489_v30  ;;  %2456 = vmatpush3.bf16.msra.mxu1 %v2917_v19  ;;  %v3022_v51 = vld [vmem:[#allocation2 + $0x20] sm:$0xff] }
  0x45   : > { %2261 = vmatmul.mubr.msk.f32.gmra.mrb[2].mxu1 %vm374_vm0, %v2962_v35  ;;  %2458 = vmatprep.subr.bf16.mxu1 %v2457_v32  ;;  %v2986_v18 = vld [vmem:[#allocation2 + $0x61] sm:$0xff]  ;;  %v3024_v52 = vld [vmem:[#allocation2 + $0x32] sm:$0xff] }
  0x46   : > { %2341 = vmatmul.mubr.msk.f32.gmra.mrb[2].mxu0 %vm374_vm0, %v2973_v38  ;;  %2263 = vmatprep.mubr.msk.f32.mxu1 %vm374_vm0, %v2973_v38  ;;  %v2988_v42 = vld [vmem:[#allocation2 + $0x71] sm:$0xff]  ;;  %v3048_v60 = vld [vmem:[#allocation2 + $0x42] sm:$0xff] }
  0x47   : > { %2343 = vmatprep.mubr.msk.f32.mxu0 %vm374_vm0, %v2975_v39  ;;  %2492 = vmatpush3.bf16.msra.mxu0 %v2489_v30  ;;  %v2998_v19 = vld [vmem:[#allocation2 + $0x81] sm:$0xff]  ;;  %v3038_v57 = vld [vmem:[#allocation2 + $0x30] sm:$0xff]  ;;  %v2732_v30 = vmov 0.0|0.0  }
  0x48   : > { %2460 = vmatpush3.bf16.msra.mxu1 %v2457_v32  ;;  %2494 = vmatprep.subr.bf16.mxu0 %v2493_v40  ;;  %v3050_v61 = vld [vmem:[#allocation2 + $0x40] sm:$0xff]  ;;  %v3052_v62 = vld [vmem:[#allocation2 + $0x52] sm:$0xff] }
  0x49   : > { %2264 = vmatmul.mubr.msk.f32.gmra.mrb[4].mxu1 %vm374_vm0, %v2975_v39  ;;  %2462 = vmatprep.subr.bf16.mxu1 %v2461_v41  ;;  %v3060_v1 = vld [vmem:[#allocation2 + $0x50] sm:$0xff]  ;;  %v3064_v2 = vld [vmem:[#allocation2 + $0x62] sm:$0xff]  ;;  %v1778_v32 = vld [vmem:[%s3285_s5 + $0x18] sm:$0xff] }
  0x4a   : > { %2344 = vmatmul.mubr.msk.f32.gmra.mrb[4].mxu0 %vm374_vm0, %v2986_v18  ;;  %2266 = vmatprep.mubr.msk.f32.mxu1 %vm374_vm0, %v2986_v18  ;;  %v3066_v3 = vld [vmem:[#allocation2 + $0x60] sm:$0xff]  ;;  %v3068_v4 = vld [vmem:[#allocation2 + $0x72] sm:$0xff] }
  0x4b   : > { %2346 = vmatprep.mubr.msk.f32.mxu0 %vm374_vm0, %v2988_v42  ;;  %v418_v5 = vld [vmem:[#allocation2 + $0x70] sm:$0xff]  ;;  %v3078_v6 = vld [vmem:[#allocation2 + $0x82] sm:$0xff] }
  0x4c   : > { %v1296_v20 = vld [vmem:[#allocation2 + $0x80] sm:$0xff]  ;;  %v1446_v25 = vld [vmem:[#allocation2 + $0x91] sm:$0xff] }
  0x4d   : > { %2267 = vmatmul.mubr.msk.f32.gmra.mrb[6].mxu1 %vm374_vm0, %v2988_v42 }
  0x4e   : > { %2347 = vmatmul.mubr.msk.f32.gmra.mrb[6].mxu0 %vm374_vm0, %v2998_v19  ;;  %2277 = vmatprep.mubr.msk.f32.mxu1 %vm374_vm0, %v411_v43 }
  0x4f   : > { %2357 = vmatprep.mubr.msk.f32.mxu0 %vm374_vm0, %v1140_v44 }
  0x51   : > { %2278 = vmatmul.mubr.msk.f32.vlgmr.msra.gmra.mrb[0].mxu1 %vm374_vm0, %v3011_v47 }
  0x52   : > { %2358 = vmatmul.mubr.msk.f32.vlgmr.msra.gmra.mrb[0].mxu0 %vm374_vm0, %v3020_v50  ;;  %2280 = vmatprep.mubr.msk.f32.mxu1 %vm374_vm0, %v3022_v51 }
  0x53   : > { %2496 = vmatpush3.bf16.msra.mxu0 %v2493_v40  ;;  %2360 = vmatprep.mubr.msk.f32.mxu0 %vm374_vm0, %v3024_v52 }
  0x54   : > { %2498 = vmatprep.subr.bf16.mxu0 %v2497_v53  ;;  %2464 = vmatpush3.bf16.msra.mxu1 %v2461_v41 }
  0x55   : > { %2281 = vmatmul.mubr.msk.f32.gmra.mrb[2].mxu1 %vm374_vm0, %v3038_v57  ;;  %2466 = vmatprep.subr.bf16.mxu1 %v2465_v54 }
  0x56   : > { %2361 = vmatmul.mubr.msk.f32.gmra.mrb[2].mxu0 %vm374_vm0, %v3048_v60  ;;  %2283 = vmatprep.mubr.msk.f32.mxu1 %vm374_vm0, %v3050_v61 }
  0x57   : > { %2363 = vmatprep.mubr.msk.f32.mxu0 %vm374_vm0, %v3052_v62  ;;  %2500 = vmatpush3.bf16.msra.mxu0 %v2497_v53 }
  0x58   : > { %2468 = vmatpush3.bf16.msra.mxu1 %v2465_v54  ;;  %2502 = vmatprep.subr.bf16.mxu0 %v2501_v63 }
  0x59   : > { %2284 = vmatmul.mubr.msk.f32.gmra.mrb[4].mxu1 %vm374_vm0, %v3060_v1  ;;  %2470 = vmatprep.subr.bf16.mxu1 %v2469_v0 }
  0x5a   : > { %2364 = vmatmul.mubr.msk.f32.gmra.mrb[4].mxu0 %vm374_vm0, %v3064_v2  ;;  %2286 = vmatprep.mubr.msk.f32.mxu1 %vm374_vm0, %v3066_v3 }
  0x5b   : > { %2366 = vmatprep.mubr.msk.f32.mxu0 %vm374_vm0, %v3068_v4 }
  0x5d   : > { %2287 = vmatmul.mubr.msk.f32.gmra.mrb[6].mxu1 %vm374_vm0, %v418_v5 }
  0x5e   : > { %2367 = vmatmul.mubr.msk.f32.gmra.mrb[6].mxu0 %vm374_vm0, %v3078_v6  ;;  %2297 = vmatprep.mubr.msk.f32.mxu1 %vm374_vm0, %v693_v8 }
  0x5f   : > { %2377 = vmatprep.mubr.msk.f32.mxu0 %vm374_vm0, %v3022_v51 }
  0x61   : > { %2298 = vmatmul.mubr.msk.f32.vlgmr.msra.gmra.mrb[0].mxu1 %vm374_vm0, %v1140_v44 }
  0x62   : > { %2378 = vmatmul.mubr.msk.f32.vlgmr.msra.gmra.mrb[0].mxu0 %vm374_vm0, %v3038_v57  ;;  %2300 = vmatprep.mubr.msk.f32.mxu1 %vm374_vm0, %v3020_v50 }
  0x63   : > { %2504 = vmatpush3.bf16.msra.mxu0 %v2501_v63  ;;  %2380 = vmatprep.mubr.msk.f32.mxu0 %vm374_vm0, %v3050_v61 }
  0x64   : > { %2506 = vmatprep.subr.bf16.mxu0 %v2505_v13  ;;  %2472 = vmatpush3.bf16.msra.mxu1 %v2469_v0 }
  0x65   : > { %2301 = vmatmul.mubr.msk.f32.gmra.mrb[2].mxu1 %vm374_vm0, %v3024_v52  ;;  %2474 = vmatprep.subr.bf16.mxu1 %v2473_v14 }
  0x66   : > { %2381 = vmatmul.mubr.msk.f32.gmra.mrb[2].mxu0 %vm374_vm0, %v3060_v1  ;;  %2303 = vmatprep.mubr.msk.f32.mxu1 %vm374_vm0, %v3048_v60 }
  0x67   : > { %2383 = vmatprep.mubr.msk.f32.mxu0 %vm374_vm0, %v3066_v3  ;;  %2508 = vmatpush3.bf16.msra.mxu0 %v2505_v13 }
  0x68   : > { %2476 = vmatpush3.bf16.msra.mxu1 %v2473_v14  ;;  %2510 = vmatprep.subr.bf16.mxu0 %v2509_v17 }
  0x69   : > { %2304 = vmatmul.mubr.msk.f32.gmra.mrb[4].mxu1 %vm374_vm0, %v3052_v62  ;;  %2517 = vmatprep.subr.bf16.mxu1 %v2732_v30 }
  0x6a   : > { %2384 = vmatmul.mubr.msk.f32.gmra.mrb[4].mxu0 %vm374_vm0, %v418_v5  ;;  %2306 = vmatprep.mubr.msk.f32.mxu1 %vm374_vm0, %v3064_v2 }
  0x6b   : > { %2386 = vmatprep.mubr.msk.f32.mxu0 %vm374_vm0, %v1296_v20 }
  0x6d   : > { %2307 = vmatmul.mubr.msk.f32.gmra.mrb[6].mxu1 %vm374_vm0, %v3068_v4 }
  0x6e   : > { %2387 = vmatmul.mubr.msk.f32.gmra.mrb[6].mxu0 %vm374_vm0, %v1297_v21  ;;  %2317 = vmatprep.mubr.msk.f32.mxu1 %vm374_vm0, %v3011_v47 }
  0x6f   : > { %2397 = vmatprep.mubr.msk.f32.mxu0 %vm374_vm0, %v2950_v31  ;;  %v1777_v31 = vld [vmem:[%s3285_s5 + $0x10] sm:$0xff] }
  0x70   : > { %v2521_v33 = vpack.c.bf16 %v1778_v32, %v1777_v31 }
  0x71   : > { %2318 = vmatmul.mubr.msk.f32.vlgmr.msra.gmra.mrb[0].mxu1 %vm374_vm0, %v3022_v51 }
  0x72   : > { %2398 = vmatmul.mubr.msk.f32.vlgmr.msra.gmra.mrb[0].mxu0 %vm374_vm0, %v2962_v35  ;;  %2320 = vmatprep.mubr.msk.f32.mxu1 %vm374_vm0, %v3038_v57 }
  0x73   : > { %2512 = vmatpush3.bf16.msra.mxu0 %v2509_v17  ;;  %2400 = vmatprep.mubr.msk.f32.mxu0 %vm374_vm0, %v2973_v38 }
  0x74   : > { %2514 = vmatprep.subr.bf16.mxu0 %v2513_v24  ;;  %2519 = vmatpush3.bf16.msra.mxu1 %v2518_v29 }
  0x75   : > { %2321 = vmatmul.mubr.msk.f32.gmra.mrb[2].mxu1 %vm374_vm0, %v3050_v61  ;;  %2520 = vmatprep.subr.bf16.mxu1 %v2732_v30 }
  0x76   : > { %2401 = vmatmul.mubr.msk.f32.gmra.mrb[2].mxu0 %vm374_vm0, %v2975_v39  ;;  %2323 = vmatprep.mubr.msk.f32.mxu1 %vm374_vm0, %v3060_v1 }
  0x77   : > { %2403 = vmatprep.mubr.msk.f32.mxu0 %vm374_vm0, %v2986_v18  ;;  %2516 = vmatpush3.bf16.msra.mxu0 %v2513_v24 }
  0x78   : > { %2522 = vmatpush3.bf16.msra.mxu1 %v2521_v33 }
  0x79   : > { %2324 = vmatmul.mubr.msk.f32.gmra.mrb[4].mxu1 %vm374_vm0, %v3066_v3  ;;  %2440 = vmatprep.subr.mxu1 %v2731_v7 }
  0x7a   : > { %2404 = vmatmul.mubr.msk.f32.gmra.mrb[4].mxu0 %vm374_vm0, %v2988_v42  ;;  %2326 = vmatprep.mubr.msk.f32.mxu1 %vm374_vm0, %v418_v5  ;;  %v2123_v42 = vld [vmem:[%s3284_s4] ss:$0 sm:$0xff] }
  0x7b   : > { %2406 = vmatprep.mubr.msk.f32.mxu0 %vm374_vm0, %v2998_v19 }
  0x7d   : > { %2327 = vmatmul.mubr.msk.f32.gmra.mrb[6].mxu1 %vm374_vm0, %v1296_v20 }
  0x7e   : > { %2407 = vmatmul.mubr.msk.f32.gmra.mrb[6].mxu0 %vm374_vm0, %v1446_v25  ;;  %2437 = vmatprep.mubr.msk.f32.mxu1 %vm2733_vm3, %v2731_v7 }
  0x7f   : > { %2417 = vmatprep.mubr.msk.f32.mxu0 %vm374_vm0, %v3020_v50 }
  0x82   : > { %2418 = vmatmul.mubr.msk.f32.vlgmr.msra.gmra.mrb[0].mxu0 %vm374_vm0, %v3024_v52 }
  0x83   : > { %2420 = vmatprep.mubr.msk.f32.mxu0 %vm374_vm0, %v3048_v60 }
  0x86   : > { %2421 = vmatmul.mubr.msk.f32.gmra.mrb[2].mxu0 %vm374_vm0, %v3052_v62 }
  0x87   : > { %2423 = vmatprep.mubr.msk.f32.mxu0 %vm374_vm0, %v3064_v2 }
  0x8a   : > { %2424 = vmatmul.mubr.msk.f32.gmra.mrb[4].mxu0 %vm374_vm0, %v3068_v4 }
  0x8b   : > { %2426 = vmatprep.mubr.msk.f32.mxu0 %vm374_vm0, %v3078_v6 }
  0x8e   : > { %2427 = vmatmul.mubr.msk.f32.gmra.mrb[6].mxu0 %vm374_vm0, %v1595_v26  ;;  %v1853_v26 = vld [vmem:[%s3286_s6] sm:$0xf] }
 0x144   : > { %v2319_v34 = vpop.f32.mrb[0].mxu1 }
 0x145   : > { %v944_v35 = vpop.f32.mrb[1].mxu1 }
 0x148   : > { %v2322_v36 = vpop.f32.mrb[2].mxu1 }
 0x149   : > { %v954_v37 = vpop.f32.mrb[3].mxu1 }
 0x14c   : > { %v2325_v38 = vpop.f32.mrb[4].mxu1 }
 0x14d   : > { %v964_v39 = vpop.f32.mrb[5].mxu1 }
 0x150   : > { %v2328_v40 = vpop.f32.mrb[6].mxu1 }
 0x151   : > { %v974_v41 = vpop.f32.mrb[7].mxu1 }
 0x155   : > { %v2419_v18 = vpop.f32.mrb[0].mxu0 }
 0x156   : > { %v2523_v19 = vadd.f32 %v2419_v18, %v2319_v34  ;;  %v1690_v43 = vpop.f32.mrb[1].mxu0 }
 0x157   : > { %v2524_v44 = vadd.f32 %v1690_v43, %v944_v35  ;;  %v1938_v35 = vlaneseq }
 0x158   : > { %v3196_v45 = vadd.f32 %v2523_v19, %v2123_v42 }
 0x159   : > { %v3198_v46 = vadd.f32 %v2524_v44, %v2123_v42  ;;  %v2422_v47 = vpop.f32.mrb[2].mxu0 }
 0x15a   : > { %v2525_v48 = vadd.f32 %v2422_v47, %v2322_v36  ;;  %v1700_v49 = vpop.f32.mrb[3].mxu0  ;;  %v1753_v50 = vsel %vm374_vm0, %v3196_v45, 0.0  ;;  %v1939_v36 = vshrl.u32 %v1938_v35, 7 }
 0x15b   : > { %v1752_v51 = vsel %vm374_vm0, %v3198_v46, 0.0  ;;  %v2526_v52 = vadd.f32 %v1700_v49, %v954_v37 }
 0x15c   : > { %v3204_v53 = vadd.f32 %v2525_v48, %v2123_v42  ;;  %v1754_v56 = vadd.f32 %v1753_v50, %v1752_v51  ;;  %v1940_v37 = vsub.s32 0, %v1939_v36 }
 0x15d   : > { %v1746_v54 = vadd.f32 %v2526_v52, %v2123_v42  ;;  %v2425_v55 = vpop.f32.mrb[4].mxu0 }
 0x15e   : > { %v2527_v57 = vadd.f32 %v2425_v55, %v2325_v38  ;;  %v1710_v58 = vpop.f32.mrb[5].mxu0  ;;  %v1757_v62 = vsel %vm374_vm0, %v3204_v53, 0.0 }
 0x15f   : > { %v1755_v59 = vsel %vm374_vm0, %v1746_v54, 0.0  ;;  %v2528_v60 = vadd.f32 %v1710_v58, %v964_v39 }
 0x160   : > { %v1756_v61 = vadd.f32 %v1755_v59, %v1754_v56  ;;  %v1749_v63 = vadd.f32 %v2527_v57, %v2123_v42 }
 0x161   : > { %v1748_v0 = vadd.f32 %v2528_v60, %v2123_v42  ;;  %v2428_v1 = vpop.f32.mrb[6].mxu0 }
 0x162   : > { %v1758_v2 = vadd.f32 %v1757_v62, %v1756_v61  ;;  %v2529_v3 = vadd.f32 %v2428_v1, %v2328_v40  ;;  %v1720_v4 = vpop.f32.mrb[7].mxu0  ;;  %v1761_v9 = vsel %vm374_vm0, %v1749_v63, 0.0 }
 0x163   : > { %v1759_v5 = vsel %vm374_vm0, %v1748_v0, 0.0  ;;  %v2530_v6 = vadd.f32 %v1720_v4, %v974_v41 }
 0x164   : > { %v1760_v8 = vadd.f32 %v1759_v5, %v1758_v2  ;;  %v1751_v10 = vadd.f32 %v2529_v3, %v2123_v42 }
 0x165   : > { %v1750_v11 = vadd.f32 %v2530_v6, %v2123_v42 }
 0x166   : > { %v1762_v12 = vadd.f32 %v1761_v9, %v1760_v8  ;;  %v1765_v15 = vsel %vm374_vm0, %v1751_v10, 0.0 }
 0x167   : > { %v1763_v13 = vsel %vm374_vm0, %v1750_v11, 0.0 }
 0x168   : > { %v1764_v14 = vadd.f32 %v1763_v13, %v1762_v12 }
 0x16a   : > { %v1766_v16 = vadd.f32 %v1765_v15, %v1764_v14 }
 0x16c   : > { %v1767_v17 = vrot.slane %v1766_v16, 4 }
 0x16e   : > { %v1768_v20 = vadd.f32 %v1767_v17, %v1766_v16 }
 0x170   : > { %v1769_v21 = vrot.slane %v1768_v20, 2 }
 0x172   : > { %v1770_v22 = vadd.f32 %v1769_v21, %v1768_v20 }
 0x174   : > { %v1771_v23 = vrot.slane %v1770_v22, 1 }
 0x176   : > { %v1772_v24 = vadd.f32 %v1771_v23, %v1770_v22 }
 0x178   : > { %v1774_v25 = vmul.f32 0.015625, %v1772_v24 }
 0x17a   : > { %2438 = vmatmul.mubr.msk.f32.vlgmr.msra.gmra.mrb[8].mxu1 %vm374_vm0, %v1774_v25 }
 0x17b   : > { %2441 = vmatpush3.msk.msra.mxu1 %vm1858_vm4, %v1853_v26  ;;  %2442 = vmatprep.mubr.msk.f32.mxu1 %vm2733_vm3, %v2731_v7 }
 0x24d   : > { %v1848_v27 = vpop.f32.mrb[8].mxu1 }
 0x24e   : > { %v1852_v28 = vmax.f32 %v1848_v27, 0.0  ;;  %v2439_v29 = vpop.f32.mrb[9].mxu1 }
 0x250   : > { %2443 = vmatmul.mubr.msk.f32.vlgmr.msra.gmra.mrb[10].mxu1 %vm1854_vm5, %v1852_v28 }
 0x323   : > { %v1928_v30 = vpop.f32.mrb[10].mxu1 }
 0x324   : > { %v2127_v31 = vmul.f32 -1.442695, %v1928_v30  ;;  %v2444_v32 = vpop.f32.mrb[11].mxu1 }
 0x326   : > { %2663 = vpow2.f32 %v2127_v31 }
 0x330   : > { %v2664_v33 = vpop.eup %2663 }
 0x331   : > { %v1935_v34 = vadd.f32 1.0, %v2664_v33 }
 0x333   : > { %2665 = vrcp.f32 %v1935_v34 }
 0x33d   : > { %v2666_v38 = vpop.eup %2665 }
 0x33e   : > { %v1941_v7 = vrot.slane %v2666_v38, %v1940_v37 }
 0x340   : > { %v1942_v39 = vmul.f32 %v1941_v7, %v3198_v46  ;;  %v1943_v40 = vmul.f32 %v1941_v7, %v3196_v45  ;;  %v1944_v41 = vmul.f32 %v1941_v7, %v1746_v54  ;;  %v1945_v18 = vmul.f32 %v1941_v7, %v3204_v53 }
 0x341   : > { %v1946_v42 = vmul.f32 %v1941_v7, %v1748_v0  ;;  %v1947_v19 = vmul.f32 %v1941_v7, %v1749_v63  ;;  %v1948_v43 = vmul.f32 %v1941_v7, %v1750_v11  ;;  %v1949_v44 = vmul.f32 %v1941_v7, %v1751_v10 }
 0x342   : > { %1950 = vst.msk [vmem:[%s272_s9] sm:$0xff] %vm374_vm0, %v1942_v39  ;;  %1951 = vst.msk [vmem:[%s272_s9 + $0x8] sm:$0xff] %vm374_vm0, %v1943_v40 }
 0x343   : > { %1952 = vst.msk [vmem:[%s272_s9 + $0x10] sm:$0xff] %vm374_vm0, %v1944_v41  ;;  %1953 = vst.msk [vmem:[%s272_s9 + $0x18] sm:$0xff] %vm374_vm0, %v1945_v18 }
 0x344   : > { %1954 = vst.msk [vmem:[%s272_s9 + $0x20] sm:$0xff] %vm374_vm0, %v1946_v42  ;;  %1955 = vst.msk [vmem:[%s272_s9 + $0x28] sm:$0xff] %vm374_vm0, %v1947_v19 }
 0x345   : > { %1956 = vst.msk [vmem:[%s272_s9 + $0x30] sm:$0xff] %vm374_vm0, %v1948_v43  ;;  %1957 = vst.msk [vmem:[%s272_s9 + $0x38] sm:$0xff] %vm374_vm0, %v1949_v44 }
 0x346   : > { %2680 = shalt.err (!%p2677_p3)
}
 0x347   : > { %s2681_s20 = scalar_lea.hbm %s3227_s16, 1024  ;;  %s2685_s23 = scalar_lea.hbm %s3287_s7, 2048 }
 0x348   : > { %p2682_p4 = scmp.ne.s32.totalorder %s3227_s16, %s2681_s20  ;;  %p2686_p9 = scmp.lt.u32.totalorder %s3227_s16, %s3287_s7 }
 0x349   : > { %p2687_p10 = scmp.lt.u32.totalorder %s2685_s23, %s2681_s20  ;;  %p2689_p12 = scmp.lt.u32.totalorder %s2681_s20, %s3227_s16 }
 0x34a   : > { %p2683_p7 = pnand %p2682_p4, %p2815_p5 }
 0x34b   : > { %p2688_p11 = por %p2687_p10, %p2686_p9 }
 0x34c   : > { %p2684_p8 = pneg %p2683_p7 }
 0x34d   : > { %p2690_p13 = por %p2689_p12, %p2688_p11 }
 0x34f   : > { %p2691_p0 = pnand %p2690_p13, %p2684_p8 }
 0x351   : > { %2694 = shalt.err (!%p2691_p0)
}
 0x352   : > { %s2735_s14 = smov 128   ;;  %s2736_s15 = smov 8  }
 0x353   : > { %2587 = dma.vmem_to_hbm [thread:$0]  (%p2815_p5), %s3229_s13, 1024, %s3227_s16, %s3239_s28, %s2735_s14, %s2735_s14, %s2736_s15  }
 0x354 PF: > { %p2593_p1 = scmp.ge.s32.totalorder %s2729_s27, 2  ;;  %s1987_s17 = sand.u32 1, %s2717_s24  }
 0x355   : > { %s1988_s18 = scalar_lea.sflag [#allocation4], %s1987_s17 }
 0x356   : > { %p2590_p2 = pnand %p2593_p1, %p2819_p6 }
 0x358   : > { %2712 = dma.done.wait (!%p2590_p2), %s1988_s18, 1024  }
 0x359   : > { %2714 = vsyncadd (!%p2590_p2), %s1988_s18, 4294966272  ;;  %p17_p3 = scmp.ge.s32.totalorder %s2802_s30, 4   ;;  %s3290_s24 = smov %s2721_s25 }
 0x35a   : > { %s3291_s25 = smov %s2725_s26  ;;  %s3292_s26 = smov %s2813_s10 }
 0x35b   : > { %s3293_s27 = smov %s2802_s30  ;;  %19 = sbr.rel (!%p17_p3) target bundleno = 3 (0x3), region = 86 }
 0x362   :  { %1993 = vsyncpa [#allocation4], 1 }
 0x363   :  { %1995 = vsyncpa [#allocation4 + $0x1], 1 }

</bundles_post_ra>
